<compile_context>
chip_gen: v7x
topology: tpu7x:2x2x1
jax: 0.10.0
libtpu: 0.0.40
codegen_flags: <defaults>
</compile_context>

<pallas_src>
import functools

import jax
import jax.numpy as jnp
from jax.experimental import pallas as pl
from jax.experimental.pallas import tpu as pltpu


def _round_up(x, m):
    return ((x + m - 1) // m) * m


def _layernorm(x, eps=1e-5):
    mu = jnp.mean(x, axis=-1, keepdims=True)
    var = jnp.mean((x - mu) * (x - mu), axis=-1, keepdims=True)
    return (x - mu) * jax.lax.rsqrt(var + eps)


def _l2_normalize(x, eps=1e-12):
    # eps keeps zero (padded) rows finite: rsqrt(eps) * 0 == 0.
    return x * jax.lax.rsqrt(jnp.sum(x * x, axis=-1, keepdims=True) + eps)


# ---------------------------------------------------------------------------
# Fused CustomCLIP kernel
# ---------------------------------------------------------------------------
def _custom_clip_kernel(x_patch_ref, w_patch_ref, pool_img_ref,
                        tok2d_ref, pool_txt_ref,
                        w_vis_ref, w_txt_ref, scale_ref,
                        li_ref):
    # ---- vision surrogate: patch embed + mean pool (MXU matmul) + LayerNorm
    # TODO(synk): at real CLIP sizes cast matmul operands to bf16 (keep f32
    # accumulation) and tile with a grid / BlockSpec index_maps instead of a
    # single VMEM-resident block.
    tok = jnp.dot(x_patch_ref[...], w_patch_ref[...],
                  preferred_element_type=jnp.float32)            # [Bp*P, HV]
    img_pooled = jnp.dot(pool_img_ref[...], tok,
                         preferred_element_type=jnp.float32)     # [Bp, HV]
    img_pooled = _layernorm(img_pooled)

    # ---- text surrogate: mean pool over tokens (MXU matmul) + LayerNorm
    txt_pooled = jnp.dot(pool_txt_ref[...], tok2d_ref[...],
                         preferred_element_type=jnp.float32)     # [Np, HT]
    txt_pooled = _layernorm(txt_pooled)

    # ---- CustomCLIP head: projections (bias-free nn.Linear), L2 norm, scale
    img_f = jnp.dot(img_pooled, w_vis_ref[...],
                    preferred_element_type=jnp.float32)          # [Bp, D]
    txt_f = jnp.dot(txt_pooled, w_txt_ref[...],
                    preferred_element_type=jnp.float32)          # [Np, D]

    img_n = _l2_normalize(img_f)
    txt_n = _l2_normalize(txt_f)

    ls = scale_ref[0, 0]   # exp(logit_scale), scalar read on the SMEM path

    # logits_img = ls * img_n @ txt_n.T  (single MXU matmul; logits_text is
    # its exact transpose, taken outside the kernel)
    li_ref[...] = ls * jax.lax.dot_general(
        img_n, txt_n, (((1,), (1,)), ((), ())),
        preferred_element_type=jnp.float32)                      # [Bp, Np]


# ---------------------------------------------------------------------------
# Wrapper (layout prep + single pallas_call)
# ---------------------------------------------------------------------------
def custom_clip_forward(image, token_emb, params, patch=4):
    B, C, H, W = image.shape
    N, L, HT = token_emb.shape
    ph, pw = H // patch, W // patch
    P = ph * pw

    # Pad batch to sublane multiple (8) and class count to lane multiple (128)
    # so the kernel output is a lane-dense, unmasked-store tile.
    B_pad = _round_up(B, 8)
    N_pad = _round_up(N, 128)
    image_p = jnp.pad(image, ((0, B_pad - B), (0, 0), (0, 0), (0, 0)))
    tok_p = jnp.pad(token_emb, ((0, N_pad - N), (0, 0), (0, 0)))

    # Patch extraction (pure layout work).
    # TODO(synk): at real image sizes fold this into an index_map-driven DMA
    # instead of materializing the patch tensor in HBM.
    x = image_p.reshape(B_pad, C, ph, patch, pw, patch)
    x = x.transpose(0, 2, 4, 1, 3, 5).reshape(B_pad * P, C * patch * patch)

    tok2d = tok_p.reshape(N_pad * L, HT)

    # Mean-pool expressed as matmuls so the pooling runs on the MXU inside the
    # fused kernel (no 3-D sublane reductions needed).
    pool_img = jnp.kron(jnp.eye(B_pad, dtype=jnp.float32),
                        jnp.full((1, P), 1.0 / P, jnp.float32))    # [Bp, Bp*P]
    pool_txt = jnp.kron(jnp.eye(N_pad, dtype=jnp.float32),
                        jnp.full((1, L), 1.0 / L, jnp.float32))    # [Np, Np*L]

    # logit_scale.exp() — part of the forward, computed in the jitted wrapper
    # and handed to the kernel as an SMEM scalar (no padded VMEM tile).
    ls_exp = jnp.exp(params["logit_scale"]).astype(jnp.float32)    # (1, 1)

    vmem = pl.BlockSpec(memory_space=pltpu.MemorySpace.VMEM)
    smem = pl.BlockSpec(memory_space=pltpu.MemorySpace.SMEM)

    li_pad = pl.pallas_call(
        _custom_clip_kernel,
        out_shape=jax.ShapeDtypeStruct((B_pad, N_pad), jnp.float32),
        in_specs=[vmem, vmem, vmem, vmem, vmem, vmem, vmem, smem],
        out_specs=vmem,
    )(x, params["w_patch"], pool_img, tok2d, pool_txt,
      params["w_vis"], params["w_txt"], ls_exp)

    logits_img = li_pad[:B, :N]       # [B, N]
    logits_text = logits_img.T        # == ls * txt_n @ img_n.T, no 2nd matmul
    return logits_img, logits_text


# ---------------------------------------------------------------------------
# Pure-JAX reference of the same surrogate forward (for correctness check)
# ---------------------------------------------------------------------------
def reference_forward(image, token_emb, params, patch=4):
    B, C, H, W = image.shape
    ph, pw = H // patch, W // patch
    x = image.reshape(B, C, ph, patch, pw, patch)
    x = x.transpose(0, 2, 4, 1, 3, 5).reshape(B * ph * pw, C * patch * patch)
    tok = x @ params["w_patch"]
    img_pooled = _layernorm(jnp.mean(tok.reshape(B, ph * pw, -1), axis=1))
    txt_pooled = _layernorm(jnp.mean(token_emb, axis=1))
    img_f = img_pooled @ params["w_vis"]
    txt_f = txt_pooled @ params["w_txt"]
    img_n = _l2_normalize(img_f)
    txt_n = _l2_normalize(txt_f)
    ls = jnp.exp(params["logit_scale"][0, 0])
    li = ls * img_n @ txt_n.T
    return li, li.T


if __name__ == "__main__":
    key = jax.random.PRNGKey(0)
    k_img, k_tok, k_patch, k_vis, k_txt = jax.random.split(key, 5)

    B, C, H, W = 2, 3, 16, 16        # NCHW images
    N_CLS, L = 8, 8                  # classnames, (mock) token length
    HV = HT = 32                     # vision / text hidden dims
    D = 32                           # shared projection dim
    PATCH = 4

    image = jax.random.normal(k_img, (B, C, H, W), jnp.float32)
    # TODO(synk): HF tokenizer + pretrained text transformer have no Pallas
    # equivalent; surrogate = deterministic token embeddings.
    token_emb = jax.random.normal(k_tok, (N_CLS, L, HT), jnp.float32)

    params = {
        # TODO(synk): stands in for the pretrained ViT backbone's patch embed.
        "w_patch": 0.02 * jax.random.normal(k_patch, (C * PATCH * PATCH, HV),
                                            jnp.float32),
        # nn.Linear(hidden, D, bias=False) weights, pre-transposed to [hidden, D]
        "w_vis": 0.02 * jax.random.normal(k_vis, (HV, D), jnp.float32),
        "w_txt": 0.02 * jax.random.normal(k_txt, (HT, D), jnp.float32),
        # CLIP init: logit_scale = ln(1/0.07)
        "logit_scale": jnp.full((1, 1), jnp.log(1.0 / 0.07), jnp.float32),
    }

    fwd = jax.jit(functools.partial(custom_clip_forward, patch=PATCH))
    logits_img, logits_text = fwd(image, token_emb, params)
    jax.block_until_ready((logits_img, logits_text))

    ref_img, ref_text = reference_forward(image, token_emb, params, patch=PATCH)

    assert logits_img.shape == (B, N_CLS)
    assert logits_text.shape == (N_CLS, B)
    assert bool(jnp.all(jnp.isfinite(logits_img)))
    assert bool(jnp.all(jnp.isfinite(logits_text)))
    assert bool(jnp.allclose(logits_img, ref_img, atol=1e-2, rtol=1e-2))
    assert bool(jnp.allclose(logits_text, ref_text, atol=1e-2, rtol=1e-2))
    print("KERNEL_OK")
</pallas_src>

<mosaic_0001>
module attributes {stable_mosaic.version = 11 : i64} {
  func.func @_custom_clip_kernel(%arg0: memref<128x48xf32, #tpu.memory_space<vmem>>, %arg1: memref<48x32xf32, #tpu.memory_space<vmem>>, %arg2: memref<8x128xf32, #tpu.memory_space<vmem>>, %arg3: memref<1024x32xf32, #tpu.memory_space<vmem>>, %arg4: memref<128x1024xf32, #tpu.memory_space<vmem>>, %arg5: memref<32x32xf32, #tpu.memory_space<vmem>>, %arg6: memref<32x32xf32, #tpu.memory_space<vmem>>, %arg7: memref<1x1xf32, #tpu.memory_space<smem>>, %arg8: memref<8x128xf32, #tpu.memory_space<vmem>>) attributes {dimension_semantics = [], scalar_prefetch = 0 : i64, scratch_operands = 0 : i64, tpu.core_type = #tpu.core_type<tc>} {
    %c0 = arith.constant 0 : index
    %c0_0 = arith.constant 0 : index
    %0 = vector.load %arg0[%c0, %c0_0] : memref<128x48xf32, #tpu.memory_space<vmem>>, vector<128x48xf32>
    %c0_1 = arith.constant 0 : index
    %c0_2 = arith.constant 0 : index
    %1 = vector.load %arg1[%c0_1, %c0_2] : memref<48x32xf32, #tpu.memory_space<vmem>>, vector<48x32xf32>
    %cst = arith.constant dense<0.000000e+00> : vector<128x32xf32>
    %2 = tpu.matmul %0, %1, %cst {dimension_numbers = #tpu.dot_dimension_numbers<[1], [0], [0], [1], [0, 0, 1, 1], [], []>} : vector<128x48xf32>, vector<48x32xf32>, vector<128x32xf32> -> vector<128x32xf32>
    %c0_3 = arith.constant 0 : index
    %c0_4 = arith.constant 0 : index
    %3 = vector.load %arg2[%c0_3, %c0_4] : memref<8x128xf32, #tpu.memory_space<vmem>>, vector<8x128xf32>
    %cst_5 = arith.constant dense<0.000000e+00> : vector<8x32xf32>
    %4 = tpu.matmul %3, %2, %cst_5 {dimension_numbers = #tpu.dot_dimension_numbers<[1], [0], [0], [1], [0, 0, 1, 1], [], []>} : vector<8x128xf32>, vector<128x32xf32>, vector<8x32xf32> -> vector<8x32xf32>
    %cst_6 = arith.constant dense<0.000000e+00> : vector<8xf32>
    %5 = vector.multi_reduction <add>, %4, %cst_6 [1] : vector<8x32xf32> to vector<8xf32>
    %6 = vector.shape_cast %5 : vector<8xf32> to vector<8x1xf32>
    %cst_7 = arith.constant 3.200000e+01 : f32
    %7 = vector.broadcast %cst_7 : f32 to vector<8x1xf32>
    %8 = arith.divf %6, %7 : vector<8x1xf32>
    %9 = vector.broadcast %8 : vector<8x1xf32> to vector<8x32xf32>
    %10 = arith.subf %4, %9 : vector<8x32xf32>
    %11 = vector.broadcast %8 : vector<8x1xf32> to vector<8x32xf32>
    %12 = arith.subf %4, %11 : vector<8x32xf32>
    %13 = arith.mulf %10, %12 : vector<8x32xf32>
    %cst_8 = arith.constant dense<0.000000e+00> : vector<8xf32>
    %14 = vector.multi_reduction <add>, %13, %cst_8 [1] : vector<8x32xf32> to vector<8xf32>
    %15 = vector.shape_cast %14 : vector<8xf32> to vector<8x1xf32>
    %cst_9 = arith.constant 3.200000e+01 : f32
    %16 = vector.broadcast %cst_9 : f32 to vector<8x1xf32>
    %17 = arith.divf %15, %16 : vector<8x1xf32>
    %18 = vector.broadcast %8 : vector<8x1xf32> to vector<8x32xf32>
    %19 = arith.subf %4, %18 : vector<8x32xf32>
    %cst_10 = arith.constant 9.99999974E-6 : f32
    %20 = vector.broadcast %cst_10 : f32 to vector<8x1xf32>
    %21 = arith.addf %17, %20 : vector<8x1xf32>
    %22 = math.rsqrt %21 : vector<8x1xf32>
    %23 = vector.broadcast %22 : vector<8x1xf32> to vector<8x32xf32>
    %24 = arith.mulf %19, %23 : vector<8x32xf32>
    %c0_11 = arith.constant 0 : index
    %c0_12 = arith.constant 0 : index
    %25 = vector.load %arg4[%c0_11, %c0_12] : memref<128x1024xf32, #tpu.memory_space<vmem>>, vector<128x1024xf32>
    %c0_13 = arith.constant 0 : index
    %c0_14 = arith.constant 0 : index
    %26 = vector.load %arg3[%c0_13, %c0_14] : memref<1024x32xf32, #tpu.memory_space<vmem>>, vector<1024x32xf32>
    %cst_15 = arith.constant dense<0.000000e+00> : vector<128x32xf32>
    %27 = tpu.matmul %25, %26, %cst_15 {dimension_numbers = #tpu.dot_dimension_numbers<[1], [0], [0], [1], [0, 0, 1, 1], [], []>} : vector<128x1024xf32>, vector<1024x32xf32>, vector<128x32xf32> -> vector<128x32xf32>
    %cst_16 = arith.constant dense<0.000000e+00> : vector<128xf32>
    %28 = vector.multi_reduction <add>, %27, %cst_16 [1] : vector<128x32xf32> to vector<128xf32>
    %29 = vector.shape_cast %28 : vector<128xf32> to vector<128x1xf32>
    %cst_17 = arith.constant 3.200000e+01 : f32
    %30 = vector.broadcast %cst_17 : f32 to vector<128x1xf32>
    %31 = arith.divf %29, %30 : vector<128x1xf32>
    %32 = vector.broadcast %31 : vector<128x1xf32> to vector<128x32xf32>
    %33 = arith.subf %27, %32 : vector<128x32xf32>
    %34 = vector.broadcast %31 : vector<128x1xf32> to vector<128x32xf32>
    %35 = arith.subf %27, %34 : vector<128x32xf32>
    %36 = arith.mulf %33, %35 : vector<128x32xf32>
    %cst_18 = arith.constant dense<0.000000e+00> : vector<128xf32>
    %37 = vector.multi_reduction <add>, %36, %cst_18 [1] : vector<128x32xf32> to vector<128xf32>
    %38 = vector.shape_cast %37 : vector<128xf32> to vector<128x1xf32>
    %cst_19 = arith.constant 3.200000e+01 : f32
    %39 = vector.broadcast %cst_19 : f32 to vector<128x1xf32>
    %40 = arith.divf %38, %39 : vector<128x1xf32>
    %41 = vector.broadcast %31 : vector<128x1xf32> to vector<128x32xf32>
    %42 = arith.subf %27, %41 : vector<128x32xf32>
    %cst_20 = arith.constant 9.99999974E-6 : f32
    %43 = vector.broadcast %cst_20 : f32 to vector<128x1xf32>
    %44 = arith.addf %40, %43 : vector<128x1xf32>
    %45 = math.rsqrt %44 : vector<128x1xf32>
    %46 = vector.broadcast %45 : vector<128x1xf32> to vector<128x32xf32>
    %47 = arith.mulf %42, %46 : vector<128x32xf32>
    %c0_21 = arith.constant 0 : index
    %c0_22 = arith.constant 0 : index
    %48 = vector.load %arg5[%c0_21, %c0_22] : memref<32x32xf32, #tpu.memory_space<vmem>>, vector<32x32xf32>
    %cst_23 = arith.constant dense<0.000000e+00> : vector<8x32xf32>
    %49 = tpu.matmul %24, %48, %cst_23 {dimension_numbers = #tpu.dot_dimension_numbers<[1], [0], [0], [1], [0, 0, 1, 1], [], []>} : vector<8x32xf32>, vector<32x32xf32>, vector<8x32xf32> -> vector<8x32xf32>
    %c0_24 = arith.constant 0 : index
    %c0_25 = arith.constant 0 : index
    %50 = vector.load %arg6[%c0_24, %c0_25] : memref<32x32xf32, #tpu.memory_space<vmem>>, vector<32x32xf32>
    %cst_26 = arith.constant dense<0.000000e+00> : vector<128x32xf32>
    %51 = tpu.matmul %47, %50, %cst_26 {dimension_numbers = #tpu.dot_dimension_numbers<[1], [0], [0], [1], [0, 0, 1, 1], [], []>} : vector<128x32xf32>, vector<32x32xf32>, vector<128x32xf32> -> vector<128x32xf32>
    %52 = arith.mulf %49, %49 : vector<8x32xf32>
    %cst_27 = arith.constant dense<0.000000e+00> : vector<8xf32>
    %53 = vector.multi_reduction <add>, %52, %cst_27 [1] : vector<8x32xf32> to vector<8xf32>
    %54 = vector.shape_cast %53 : vector<8xf32> to vector<8x1xf32>
    %cst_28 = arith.constant 9.99999996E-13 : f32
    %55 = vector.broadcast %cst_28 : f32 to vector<8x1xf32>
    %56 = arith.addf %54, %55 : vector<8x1xf32>
    %57 = math.rsqrt %56 : vector<8x1xf32>
    %58 = vector.broadcast %57 : vector<8x1xf32> to vector<8x32xf32>
    %59 = arith.mulf %49, %58 : vector<8x32xf32>
    %60 = arith.mulf %51, %51 : vector<128x32xf32>
    %cst_29 = arith.constant dense<0.000000e+00> : vector<128xf32>
    %61 = vector.multi_reduction <add>, %60, %cst_29 [1] : vector<128x32xf32> to vector<128xf32>
    %62 = vector.shape_cast %61 : vector<128xf32> to vector<128x1xf32>
    %cst_30 = arith.constant 9.99999996E-13 : f32
    %63 = vector.broadcast %cst_30 : f32 to vector<128x1xf32>
    %64 = arith.addf %62, %63 : vector<128x1xf32>
    %65 = math.rsqrt %64 : vector<128x1xf32>
    %66 = vector.broadcast %65 : vector<128x1xf32> to vector<128x32xf32>
    %67 = arith.mulf %51, %66 : vector<128x32xf32>
    %c0_31 = arith.constant 0 : index
    %c0_32 = arith.constant 0 : index
    %68 = memref.load %arg7[%c0_31, %c0_32] : memref<1x1xf32, #tpu.memory_space<smem>>
    %cst_33 = arith.constant dense<0.000000e+00> : vector<8x128xf32>
    %69 = tpu.matmul %59, %67, %cst_33 {dimension_numbers = #tpu.dot_dimension_numbers<[1], [1], [0], [0], [0, 0, 1, 0], [], []>} : vector<8x32xf32>, vector<128x32xf32>, vector<8x128xf32> -> vector<8x128xf32>
    %70 = vector.broadcast %68 : f32 to vector<8x128xf32>
    %71 = arith.mulf %70, %69 : vector<8x128xf32>
    %c0_34 = arith.constant 0 : index
    %c0_35 = arith.constant 0 : index
    %72 = vector.load %arg8[%c0_34, %c0_35] : memref<8x128xf32, #tpu.memory_space<vmem>>, vector<8x128xf32>
    tpu.vector_store %arg8[%c0_34, %c0_35], %71 {strides = array<i32>} : memref<8x128xf32, #tpu.memory_space<vmem>>, vector<8x128xf32>,
    return
  }
}

</mosaic_0001>

<bundles_post_ra>
// kernel: custom_clip_forward.1
= control target key start
LH: loop header
LB: loop body
LE: loop exit
PB: predicated region body
PF: predicated region fallthrough
CT: control target
= control target key end

     0   :  { %vm52_vm0 = vcmask 392192   ;;  %vm2780_vm1 = vmmov 0   ;;  %vm317_vm2 = vcmask 261120   ;;  %s4207_s1 = inlined_call_operand.vmem [shape: f32[48,32], index: 1, kind: input, shape index: {}]   ;;  %s4208_s0 = inlined_call_operand.vmem [shape: f32[128,48], index: 0, kind: input, shape index: {}]   ;;  %s4209_s3 = inlined_call_operand.vmem [shape: f32[1024,32], index: 3, kind: input, shape index: {}]   ;;  %s4210_s4 = inlined_call_operand.vmem [shape: f32[128,1024], index: 4, kind: input, shape index: {}]   ;;  %s4211_s2 = inlined_call_operand.vmem [shape: f32[8,128], index: 2, kind: input, shape index: {}]   ;;  %s4212_s5 = inlined_call_operand.vmem [shape: f32[32,32], index: 5, kind: input, shape index: {}]   ;;  %s4213_s6 = inlined_call_operand.vmem [shape: f32[32,32], index: 6, kind: input, shape index: {}]   ;;  %s4214_s7 = inlined_call_operand.<no memory space> [shape: f32[1,1], index: 7, kind: input, shape index: {}]   ;;  %s4215_s8 = inlined_call_operand.vmem [shape: f32[8,128], index: 8, kind: output, shape index: {}]  }
   0x1   :  { %v46_v0 = vld [vmem:[%s4207_s1] sm:$0xff]  ;;  %v47_v1 = vld [vmem:[%s4207_s1 + $0x8] sm:$0xff]  ;;  %v48_v2 = vld [vmem:[%s4207_s1 + $0x10] sm:$0xff] }
   0x2   :  { %v2498_v3 = vpack.c.bf16 %v47_v1, %v46_v0  ;;  %v49_v4 = vld [vmem:[%s4207_s1 + $0x18] sm:$0xff]  ;;  %v50_v6 = vld [vmem:[%s4207_s1 + $0x20] sm:$0xff]  ;;  %v51_v7 = vld [vmem:[%s4207_s1 + $0x28] sm:$0xff] }
   0x3   :  { %v2502_v5 = vpack.c.bf16 %v49_v4, %v48_v2  ;;  %v30_v8 = vld [vmem:[%s4208_s0] sm:$0xff]  ;;  %v2506_v9 = vpack.c.bf16 %v51_v7, %v50_v6  ;;  %v477_v11 = vld [vmem:[%s4209_s3 + $0x88] sm:$0xff]  ;;  %v478_v15 = vld [vmem:[%s4209_s3 + $0x90] sm:$0xff] }
   0x4   :  { %2499 = vmatprep.subr.bf16.mxu1 %v2498_v3  ;;  %2361 = vmatprep.mubr.msk.f32.mxu1 %vm52_vm0, %v30_v8  ;;  %v476_v10 = vld [vmem:[%s4209_s3 + $0x80] sm:$0xff]  ;;  %v461_v14 = vld [vmem:[%s4209_s3 + $0x8] sm:$0xff]  ;;  %v479_v17 = vld [vmem:[%s4209_s3 + $0x98] sm:$0xff] }
   0x5   :  { %2501 = vmatpush3.bf16.msra.mxu1 %v2498_v3  ;;  %v2534_v12 = vpack.c.bf16 %v477_v11, %v476_v10  ;;  %v460_v13 = vld [vmem:[%s4209_s3] sm:$0xff]  ;;  %v462_v18 = vld [vmem:[%s4209_s3 + $0x10] sm:$0xff]  ;;  %v463_v19 = vld [vmem:[%s4209_s3 + $0x18] sm:$0xff]  ;;  %v2538_v20 = vpack.c.bf16 %v479_v17, %v478_v15 }
   0x6   :  { %2503 = vmatprep.subr.bf16.mxu1 %v2502_v5  ;;  %v2536_v16 = vpack.c.bf16 %v461_v14, %v460_v13  ;;  %v480_v21 = vld [vmem:[%s4209_s3 + $0xa0] sm:$0xff]  ;;  %v481_v22 = vld [vmem:[%s4209_s3 + $0xa8] sm:$0xff]  ;;  %v2540_v23 = vpack.c.bf16 %v463_v19, %v462_v18  ;;  %v32_v28 = vld [vmem:[%s4208_s0 + $0x10] sm:$0xff] }
   0x7   :  { %2535 = vmatprep.subr.bf16.mxu0 %v2534_v12  ;;  %v31_v24 = vld [vmem:[%s4208_s0 + $0x8] sm:$0xff]  ;;  %v2542_v25 = vpack.c.bf16 %v481_v22, %v480_v21  ;;  %v464_v26 = vld [vmem:[%s4209_s3 + $0x20] sm:$0xff]  ;;  %v482_v29 = vld [vmem:[%s4209_s3 + $0xb0] sm:$0xff] }
   0x8   :  { %2537 = vmatpush3.bf16.msra.mxu0 %v2536_v16  ;;  %v465_v27 = vld [vmem:[%s4209_s3 + $0x28] sm:$0xff]  ;;  %v483_v30 = vld [vmem:[%s4209_s3 + $0xb8] sm:$0xff]  ;;  %v466_v34 = vld [vmem:[%s4209_s3 + $0x30] sm:$0xff] }
   0x9   :  { %2505 = vmatpush3.bf16.msra.mxu1 %v2502_v5  ;;  %2539 = vmatprep.subr.bf16.mxu0 %v2538_v20  ;;  %v2544_v31 = vpack.c.bf16 %v465_v27, %v464_v26  ;;  %v33_v32 = vld [vmem:[%s4208_s0 + $0x18] sm:$0xff]  ;;  %v2546_v33 = vpack.c.bf16 %v483_v30, %v482_v29  ;;  %v34_v36 = vld [vmem:[%s4208_s0 + $0x20] sm:$0xff]  ;;  %v485_v38 = vld [vmem:[%s4209_s3 + $0xc8] sm:$0xff]  ;;  %v2781_v26 = vmov 0.0  }
   0xa   :  { %2507 = vmatprep.subr.bf16.mxu1 %v2506_v9  ;;  %v467_v35 = vld [vmem:[%s4209_s3 + $0x38] sm:$0xff]  ;;  %v484_v37 = vld [vmem:[%s4209_s3 + $0xc0] sm:$0xff]  ;;  %v35_v40 = vld [vmem:[%s4208_s0 + $0x28] sm:$0xff] }
   0xb   :  { %v2548_v39 = vpack.c.bf16 %v467_v35, %v466_v34  ;;  %v2550_v41 = vpack.c.bf16 %v485_v38, %v484_v37  ;;  %v468_v42 = vld [vmem:[%s4209_s3 + $0x40] sm:$0xff]  ;;  %v469_v43 = vld [vmem:[%s4209_s3 + $0x48] sm:$0xff]  ;;  %v36_v44 = vld [vmem:[%s4208_s0 + $0x30] sm:$0xff] }
   0xc   :  { %2541 = vmatpush3.bf16.msra.mxu0 %v2540_v23  ;;  %v486_v45 = vld [vmem:[%s4209_s3 + $0xd0] sm:$0xff]  ;;  %v487_v46 = vld [vmem:[%s4209_s3 + $0xd8] sm:$0xff]  ;;  %v2552_v47 = vpack.c.bf16 %v469_v43, %v468_v42  ;;  %v38_v52 = vld [vmem:[%s4208_s0 + $0x40] sm:$0xff] }
   0xd   :  { %2509 = vmatpush3.bf16.msra.mxu1 %v2506_v9  ;;  %2543 = vmatprep.subr.bf16.mxu0 %v2542_v25  ;;  %v37_v48 = vld [vmem:[%s4208_s0 + $0x38] sm:$0xff]  ;;  %v2554_v49 = vpack.c.bf16 %v487_v46, %v486_v45  ;;  %v470_v50 = vld [vmem:[%s4209_s3 + $0x50] sm:$0xff]  ;;  %v488_v53 = vld [vmem:[%s4209_s3 + $0xe0] sm:$0xff]  ;;  %v2779_v9 = vmov 0.0|0.0  }
   0xe   :  { %v471_v51 = vld [vmem:[%s4209_s3 + $0x58] sm:$0xff]  ;;  %v489_v54 = vld [vmem:[%s4209_s3 + $0xe8] sm:$0xff]  ;;  %v472_v58 = vld [vmem:[%s4209_s3 + $0x60] sm:$0xff]  ;;  %2510 = vmatprep.subr.bf16.mxu1 %v2779_v9 }
   0xf   :  { %v2556_v55 = vpack.c.bf16 %v471_v51, %v470_v50  ;;  %v39_v56 = vld [vmem:[%s4208_s0 + $0x48] sm:$0xff]  ;;  %v2558_v57 = vpack.c.bf16 %v489_v54, %v488_v53  ;;  %v40_v60 = vld [vmem:[%s4208_s0 + $0x50] sm:$0xff]  ;;  %v41_v62 = vld [vmem:[%s4208_s0 + $0x58] sm:$0xff] }
  0x10   :  { %2362 = vmatmul.mubr.msk.f32.vlgmr.msra.gmra.mrb[0].mxu1 %vm52_vm0, %v31_v24  ;;  %2545 = vmatpush3.bf16.msra.mxu0 %v2544_v31  ;;  %v473_v59 = vld [vmem:[%s4209_s3 + $0x68] sm:$0xff]  ;;  %v42_v63 = vld [vmem:[%s4208_s0 + $0x60] sm:$0xff]  ;;  %v44_v1 = vld [vmem:[%s4208_s0 + $0x70] sm:$0xff] }
  0x11   :  { %2364 = vmatprep.mubr.msk.f32.mxu1 %vm52_vm0, %v32_v28  ;;  %2547 = vmatprep.subr.bf16.mxu0 %v2546_v33  ;;  %v2560_v61 = vpack.c.bf16 %v473_v59, %v472_v58  ;;  %v43_v0 = vld [vmem:[%s4208_s0 + $0x68] sm:$0xff]  ;;  %v45_v2 = vld [vmem:[%s4208_s0 + $0x78] sm:$0xff]  ;;  %v490_v3 = vld [vmem:[%s4209_s3 + $0xf0] sm:$0xff] }
  0x12   :  { %v491_v4 = vld [vmem:[%s4209_s3 + $0xf8] sm:$0xff]  ;;  %v474_v6 = vld [vmem:[%s4209_s3 + $0x70] sm:$0xff]  ;;  %v333_v10 = vld [vmem:[%s4210_s4 + $0x8] sm:$0xff] }
  0x13   :  { %v2562_v5 = vpack.c.bf16 %v491_v4, %v490_v3  ;;  %v475_v7 = vld [vmem:[%s4209_s3 + $0x78] sm:$0xff]  ;;  %652 = vmatprep.mubr.f32.mxu0 %v333_v10  ;;  %v332_v11 = vld [vmem:[%s4210_s4] sm:$0xff]  ;;  %v341_v12 = vld [vmem:[%s4210_s4 + $0x48] sm:$0xff] }
  0x14   :  { %2365 = vmatmul.mubr.msk.f32.gmra.mrb[2].mxu1 %vm52_vm0, %v33_v32  ;;  %2549 = vmatpush3.bf16.msra.mxu0 %v2548_v39  ;;  %v2564_v8 = vpack.c.bf16 %v475_v7, %v474_v6  ;;  %v340_v13 = vld [vmem:[%s4210_s4 + $0x40] sm:$0xff]  ;;  %v349_v14 = vld [vmem:[%s4210_s4 + $0x88] sm:$0xff]  ;;  %v543_v37 = vld [vmem:[%s4209_s3 + $0x298] sm:$0xff] }
  0x15   :  { %2367 = vmatprep.mubr.msk.f32.mxu1 %vm52_vm0, %v34_v36  ;;  %2551 = vmatprep.subr.bf16.mxu0 %v2550_v41  ;;  %v348_v15 = vld [vmem:[%s4210_s4 + $0x80] sm:$0xff]  ;;  %v357_v16 = vld [vmem:[%s4210_s4 + $0xc8] sm:$0xff]  ;;  %v542_v36 = vld [vmem:[%s4209_s3 + $0x290] sm:$0xff] }
  0x16   :  { %v356_v17 = vld [vmem:[%s4210_s4 + $0xc0] sm:$0xff]  ;;  %v365_v18 = vld [vmem:[%s4210_s4 + $0x108] sm:$0xff]  ;;  %v2602_v38 = vpack.c.bf16 %v543_v37, %v542_v36  ;;  %v526_v39 = vld [vmem:[%s4209_s3 + $0x210] sm:$0xff] }
  0x17   :  { %v364_v19 = vld [vmem:[%s4210_s4 + $0x100] sm:$0xff]  ;;  %v373_v20 = vld [vmem:[%s4210_s4 + $0x148] sm:$0xff]  ;;  %v547_v53 = vld [vmem:[%s4209_s3 + $0x2b8] sm:$0xff] }
  0x18   :  { %2368 = vmatmul.mubr.msk.f32.gmra.mrb[4].mxu1 %vm52_vm0, %v35_v40  ;;  %2553 = vmatpush3.bf16.msra.mxu0 %v2552_v47  ;;  %v372_v21 = vld [vmem:[%s4210_s4 + $0x140] sm:$0xff]  ;;  %v381_v22 = vld [vmem:[%s4210_s4 + $0x188] sm:$0xff]  ;;  %v527_v40 = vld [vmem:[%s4209_s3 + $0x218] sm:$0xff] }
  0x19   :  { %2370 = vmatprep.mubr.msk.f32.mxu1 %vm52_vm0, %v36_v44  ;;  %2555 = vmatprep.subr.bf16.mxu0 %v2554_v49  ;;  %v380_v23 = vld [vmem:[%s4210_s4 + $0x180] sm:$0xff]  ;;  %v389_v24 = vld [vmem:[%s4210_s4 + $0x1c8] sm:$0xff]  ;;  %v2604_v42 = vpack.c.bf16 %v527_v40, %v526_v39  ;;  %v550_v4 = vld [vmem:[%s4209_s3 + $0x2d0] sm:$0xff] }
  0x1a   :  { %v388_v25 = vld [vmem:[%s4210_s4 + $0x1c0] sm:$0xff]  ;;  %v541_v28 = vld [vmem:[%s4209_s3 + $0x288] sm:$0xff]  ;;  %v534_v7 = vld [vmem:[%s4209_s3 + $0x250] sm:$0xff] }
  0x1b   :  { %v540_v27 = vld [vmem:[%s4209_s3 + $0x280] sm:$0xff]  ;;  %v397_v29 = vld [vmem:[%s4210_s4 + $0x208] sm:$0xff]  ;;  %vm4158_vm3 = vmpackc.low %vm317_vm2, %vm317_vm2 }
  0x1c   :  { %2371 = vmatmul.mubr.msk.f32.gmra.mrb[6].mxu1 %vm52_vm0, %v37_v48  ;;  %2557 = vmatpush3.bf16.msra.mxu0 %v2556_v55  ;;  %v2598_v30 = vpack.c.bf16 %v541_v28, %v540_v27  ;;  %v524_v31 = vld [vmem:[%s4209_s3 + $0x200] sm:$0xff]  ;;  %v525_v32 = vld [vmem:[%s4209_s3 + $0x208] sm:$0xff]  ;;  %v530_v55 = vld [vmem:[%s4209_s3 + $0x230] sm:$0xff] }
  0x1d   :  { %2373 = vmatprep.mubr.msk.f32.mxu1 %vm52_vm0, %v38_v52  ;;  %2559 = vmatprep.subr.bf16.mxu0 %v2558_v57  ;;  %v396_v33 = vld [vmem:[%s4210_s4 + $0x200] sm:$0xff]  ;;  %v2600_v34 = vpack.c.bf16 %v525_v32, %v524_v31  ;;  %v405_v35 = vld [vmem:[%s4210_s4 + $0x248] sm:$0xff]  ;;  %v546_v52 = vld [vmem:[%s4209_s3 + $0x2b0] sm:$0xff] }
  0x1e   :  { %v404_v41 = vld [vmem:[%s4210_s4 + $0x240] sm:$0xff]  ;;  %v413_v43 = vld [vmem:[%s4210_s4 + $0x288] sm:$0xff]  ;;  %v2610_v54 = vpack.c.bf16 %v547_v53, %v546_v52 }
  0x1f   :  { %v544_v44 = vld [vmem:[%s4209_s3 + $0x2a0] sm:$0xff]  ;;  %v545_v45 = vld [vmem:[%s4209_s3 + $0x2a8] sm:$0xff] }
  0x20   :  { %2374 = vmatmul.mubr.msk.f32.gmra.mrb[8].mxu1 %vm52_vm0, %v39_v56  ;;  %2561 = vmatpush3.bf16.msra.mxu0 %v2560_v61  ;;  %v2606_v46 = vpack.c.bf16 %v545_v45, %v544_v44  ;;  %v528_v47 = vld [vmem:[%s4209_s3 + $0x220] sm:$0xff]  ;;  %v529_v48 = vld [vmem:[%s4209_s3 + $0x228] sm:$0xff]  ;;  %v531_v56 = vld [vmem:[%s4209_s3 + $0x238] sm:$0xff] }
  0x21   :  { %2376 = vmatprep.mubr.msk.f32.mxu1 %vm52_vm0, %v40_v60  ;;  %2563 = vmatprep.subr.bf16.mxu0 %v2562_v5  ;;  %v412_v49 = vld [vmem:[%s4210_s4 + $0x280] sm:$0xff]  ;;  %v2608_v50 = vpack.c.bf16 %v529_v48, %v528_v47  ;;  %v421_v51 = vld [vmem:[%s4210_s4 + $0x2c8] sm:$0xff]  ;;  %v2612_v58 = vpack.c.bf16 %v531_v56, %v530_v55  ;;  %v551_v5 = vld [vmem:[%s4209_s3 + $0x2d8] sm:$0xff] }
  0x22   :  { %v420_v57 = vld [vmem:[%s4210_s4 + $0x2c0] sm:$0xff]  ;;  %v429_v59 = vld [vmem:[%s4210_s4 + $0x308] sm:$0xff]  ;;  %v2618_v6 = vpack.c.bf16 %v551_v5, %v550_v4 }
  0x23   :  { %v548_v60 = vld [vmem:[%s4209_s3 + $0x2c0] sm:$0xff]  ;;  %v549_v61 = vld [vmem:[%s4209_s3 + $0x2c8] sm:$0xff] }
  0x24   :  { %2377 = vmatmul.mubr.msk.f32.gmra.mrb[10].mxu1 %vm52_vm0, %v41_v62  ;;  %2565 = vmatpush3.bf16.msra.mxu0 %v2564_v8  ;;  %v2614_v62 = vpack.c.bf16 %v549_v61, %v548_v60  ;;  %v437_v3 = vld [vmem:[%s4210_s4 + $0x348] sm:$0xff]  ;;  %v535_v8 = vld [vmem:[%s4209_s3 + $0x258] sm:$0xff]  ;;  %v436_v10 = vld [vmem:[%s4210_s4 + $0x340] sm:$0xff] }
  0x25   :  { %2379 = vmatprep.mubr.msk.f32.mxu1 %vm52_vm0, %v42_v63  ;;  %2599 = vmatprep.subr.bf16.mxu0 %v2598_v30  ;;  %v532_v63 = vld [vmem:[%s4209_s3 + $0x240] sm:$0xff]  ;;  %v345_v31 = vld [vmem:[%s4210_s4 + $0x68] sm:$0xff] }
  0x26   :  { %v452_v27 = vld [vmem:[%s4210_s4 + $0x3c0] sm:$0xff]  ;;  %v369_v37 = vld [vmem:[%s4210_s4 + $0x128] sm:$0xff] }
  0x27   :  { %653 = vmatmul.mubr.f32.vlgmr.msra.gmra.mrb[0].mxu0 %v332_v11  ;;  %v2620_v11 = vpack.c.bf16 %v535_v8, %v534_v7  ;;  %v336_v30 = vld [vmem:[%s4210_s4 + $0x20] sm:$0xff]  ;;  %v377_v39 = vld [vmem:[%s4210_s4 + $0x168] sm:$0xff] }
  0x28   :  { %2380 = vmatmul.mubr.msk.f32.gmra.mrb[12].mxu1 %vm52_vm0, %v43_v0  ;;  %657 = vmatprep.mubr.f32.mxu0 %v341_v12  ;;  %v533_v0 = vld [vmem:[%s4209_s3 + $0x248] sm:$0xff]  ;;  %v344_v32 = vld [vmem:[%s4210_s4 + $0x60] sm:$0xff] }
  0x29   :  { %2382 = vmatprep.mubr.msk.f32.mxu1 %vm52_vm0, %v44_v1  ;;  %2601 = vmatpush3.bf16.msra.mxu0 %v2600_v34  ;;  %v428_v1 = vld [vmem:[%s4210_s4 + $0x300] sm:$0xff]  ;;  %v445_v12 = vld [vmem:[%s4210_s4 + $0x388] sm:$0xff] }
  0x2a   :  { %2603 = vmatprep.subr.bf16.mxu0 %v2602_v38  ;;  %v352_v34 = vld [vmem:[%s4210_s4 + $0xa0] sm:$0xff]  ;;  %v401_v45 = vld [vmem:[%s4210_s4 + $0x228] sm:$0xff] }
  0x2b   :  { %658 = vmatmul.mubr.f32.gmra.mrb[2].mxu0 %v340_v13  ;;  %v552_v13 = vld [vmem:[%s4209_s3 + $0x2e0] sm:$0xff]  ;;  %v409_v47 = vld [vmem:[%s4210_s4 + $0x268] sm:$0xff] }
  0x2c   :  { %2383 = vmatmul.mubr.msk.f32.gmra.mrb[14].mxu1 %vm52_vm0, %v45_v2  ;;  %662 = vmatprep.mubr.f32.mxu0 %v349_v14  ;;  %v2616_v2 = vpack.c.bf16 %v533_v0, %v532_v63  ;;  %v553_v14 = vld [vmem:[%s4209_s3 + $0x2e8] sm:$0xff]  ;;  %v360_v36 = vld [vmem:[%s4210_s4 + $0xe0] sm:$0xff] }
  0x2d   :  { %2417 = vmatprep.mubr.msk.f32.mxu1 %vm2780_vm1, %v2781_v26  ;;  %2605 = vmatpush3.bf16.msra.mxu0 %v2604_v42  ;;  %v368_v38 = vld [vmem:[%s4210_s4 + $0x120] sm:$0xff]  ;;  %v433_v53 = vld [vmem:[%s4210_s4 + $0x328] sm:$0xff] }
  0x2e   :  { %2607 = vmatprep.subr.bf16.mxu0 %v2606_v46  ;;  %v376_v40 = vld [vmem:[%s4210_s4 + $0x160] sm:$0xff]  ;;  %v441_v55 = vld [vmem:[%s4210_s4 + $0x368] sm:$0xff] }
  0x2f   :  { %663 = vmatmul.mubr.f32.gmra.mrb[4].mxu0 %v348_v15  ;;  %v2622_v15 = vpack.c.bf16 %v553_v14, %v552_v13  ;;  %v384_v42 = vld [vmem:[%s4210_s4 + $0x1a0] sm:$0xff] }
  0x30   :  { %667 = vmatprep.mubr.f32.mxu0 %v357_v16  ;;  %v536_v16 = vld [vmem:[%s4209_s3 + $0x260] sm:$0xff] }
  0x31   :  { %2609 = vmatpush3.bf16.msra.mxu0 %v2608_v50  ;;  %v392_v44 = vld [vmem:[%s4210_s4 + $0x1e0] sm:$0xff] }
  0x32   :  { %2611 = vmatprep.subr.bf16.mxu0 %v2610_v54  ;;  %v400_v46 = vld [vmem:[%s4210_s4 + $0x220] sm:$0xff] }
  0x33   :  { %668 = vmatmul.mubr.f32.gmra.mrb[6].mxu0 %v356_v17  ;;  %v537_v17 = vld [vmem:[%s4209_s3 + $0x268] sm:$0xff]  ;;  %v408_v48 = vld [vmem:[%s4210_s4 + $0x260] sm:$0xff] }
  0x34   :  { %672 = vmatprep.mubr.f32.mxu0 %v365_v18  ;;  %v444_v18 = vld [vmem:[%s4210_s4 + $0x380] sm:$0xff] }
  0x35   :  { %2613 = vmatpush3.bf16.msra.mxu0 %v2612_v58  ;;  %v416_v50 = vld [vmem:[%s4210_s4 + $0x2a0] sm:$0xff] }
  0x36   :  { %2615 = vmatprep.subr.bf16.mxu0 %v2614_v62  ;;  %v424_v52 = vld [vmem:[%s4210_s4 + $0x2e0] sm:$0xff] }
  0x37   :  { %673 = vmatmul.mubr.f32.gmra.mrb[8].mxu0 %v364_v19  ;;  %v2624_v19 = vpack.c.bf16 %v537_v17, %v536_v16  ;;  %v432_v54 = vld [vmem:[%s4210_s4 + $0x320] sm:$0xff] }
  0x38   :  { %677 = vmatprep.mubr.f32.mxu0 %v373_v20  ;;  %v453_v20 = vld [vmem:[%s4210_s4 + $0x3c8] sm:$0xff]  ;;  %v440_v56 = vld [vmem:[%s4210_s4 + $0x360] sm:$0xff] }
  0x39   :  { %2617 = vmatpush3.bf16.msra.mxu0 %v2616_v2  ;;  %v448_v58 = vld [vmem:[%s4210_s4 + $0x3a0] sm:$0xff] }
  0x3a   :  { %2619 = vmatprep.subr.bf16.mxu0 %v2618_v6  ;;  %v456_v60 = vld [vmem:[%s4210_s4 + $0x3e0] sm:$0xff] }
  0x3b   :  { %678 = vmatmul.mubr.f32.gmra.mrb[10].mxu0 %v372_v21  ;;  %v554_v21 = vld [vmem:[%s4209_s3 + $0x2f0] sm:$0xff] }
  0x3c   :  { %682 = vmatprep.mubr.f32.mxu0 %v381_v22  ;;  %v555_v22 = vld [vmem:[%s4209_s3 + $0x2f8] sm:$0xff] }
  0x3d   :  { %2621 = vmatpush3.bf16.msra.mxu0 %v2620_v11 }
  0x3e   :  { %2623 = vmatprep.subr.bf16.mxu0 %v2622_v15 }
  0x3f   :  { %683 = vmatmul.mubr.f32.gmra.mrb[12].mxu0 %v380_v23  ;;  %v2626_v23 = vpack.c.bf16 %v555_v22, %v554_v21 }
  0x40   :  { %687 = vmatprep.mubr.f32.mxu0 %v389_v24  ;;  %v538_v24 = vld [vmem:[%s4209_s3 + $0x270] sm:$0xff] }
  0x41   :  { %2625 = vmatpush3.bf16.msra.mxu0 %v2624_v19  ;;  %v508_v19 = vld [vmem:[%s4209_s3 + $0x180] sm:$0xff] }
  0x42   :  { %2627 = vmatprep.subr.bf16.mxu0 %v2626_v23 }
  0x43   :  { %688 = vmatmul.mubr.f32.gmra.mrb[14].mxu0 %v388_v25  ;;  %v539_v25 = vld [vmem:[%s4209_s3 + $0x278] sm:$0xff] }
  0x44   :  { %692 = vmatprep.mubr.f32.mxu0 %v397_v29  ;;  %v2628_v28 = vpack.c.bf16 %v539_v25, %v538_v24  ;;  %v337_v29 = vld [vmem:[%s4210_s4 + $0x28] sm:$0xff]  ;;  %v492_v24 = vld [vmem:[%s4209_s3 + $0x100] sm:$0xff] }
  0x45   :  { %v493_v25 = vld [vmem:[%s4209_s3 + $0x108] sm:$0xff] }
  0x46   :  { %2629 = vmatpush3.bf16.msra.mxu0 %v2628_v28  ;;  %v510_v28 = vld [vmem:[%s4209_s3 + $0x190] sm:$0xff] }
  0x47   :  { %693 = vmatmul.mubr.f32.gmra.mrb[16].mxu0 %v396_v33  ;;  %2662 = vmatprep.subr.bf16.mxu0 %v2779_v9  ;;  %v353_v33 = vld [vmem:[%s4210_s4 + $0xa8] sm:$0xff] }
  0x48   :  { %697 = vmatprep.mubr.f32.mxu0 %v405_v35  ;;  %v361_v35 = vld [vmem:[%s4210_s4 + $0xe8] sm:$0xff] }
  0x4b   :  { %698 = vmatmul.mubr.f32.gmra.mrb[18].mxu0 %v404_v41  ;;  %v385_v41 = vld [vmem:[%s4210_s4 + $0x1a8] sm:$0xff] }
  0x4c   :  { %702 = vmatprep.mubr.f32.mxu0 %v413_v43  ;;  %v393_v43 = vld [vmem:[%s4210_s4 + $0x1e8] sm:$0xff] }
  0x4f   :  { %703 = vmatmul.mubr.f32.gmra.mrb[20].mxu0 %v412_v49  ;;  %v417_v49 = vld [vmem:[%s4210_s4 + $0x2a8] sm:$0xff] }
  0x50   :  { %707 = vmatprep.mubr.f32.mxu0 %v421_v51  ;;  %v425_v51 = vld [vmem:[%s4210_s4 + $0x2e8] sm:$0xff] }
  0x53   :  { %708 = vmatmul.mubr.f32.gmra.mrb[22].mxu0 %v420_v57  ;;  %v449_v57 = vld [vmem:[%s4210_s4 + $0x3a8] sm:$0xff] }
  0x54   :  { %712 = vmatprep.mubr.f32.mxu0 %v429_v59  ;;  %v457_v59 = vld [vmem:[%s4210_s4 + $0x3e8] sm:$0xff] }
  0x57   :  { %713 = vmatmul.mubr.f32.gmra.mrb[24].mxu0 %v428_v1 }
  0x58   :  { %717 = vmatprep.mubr.f32.mxu0 %v437_v3 }
  0x5b   :  { %718 = vmatmul.mubr.f32.gmra.mrb[26].mxu0 %v436_v10 }
  0x5c   :  { %722 = vmatprep.mubr.f32.mxu0 %v445_v12 }
  0x5f   :  { %723 = vmatmul.mubr.f32.gmra.mrb[28].mxu0 %v444_v18 }
  0x60   :  { %727 = vmatprep.mubr.f32.mxu0 %v453_v20  ;;  %v509_v20 = vld [vmem:[%s4209_s3 + $0x188] sm:$0xff] }
  0x61   :  { %v2566_v23 = vpack.c.bf16 %v509_v20, %v508_v19  ;;  %v343_v19 = vld [vmem:[%s4210_s4 + $0x58] sm:$0xff] }
  0x63   :  { %728 = vmatmul.mubr.f32.gmra.mrb[30].mxu0 %v452_v27 }
  0x64   :  { %942 = vmatprep.mubr.f32.mxu0 %v337_v29  ;;  %v511_v29 = vld [vmem:[%s4209_s3 + $0x198] sm:$0xff] }
  0x67   :  { %943 = vmatmul.mubr.f32.vlgmr.msra.gmra.mrb[32].mxu0 %v336_v30  ;;  %v246_v30 = vld [vmem:[%s4211_s2] sm:$0xff] }
  0x68   :  { %947 = vmatprep.mubr.f32.mxu0 %v345_v31  ;;  %v2568_v31 = vpack.c.bf16 %v493_v25, %v492_v24  ;;  %v577_v24 = vld [vmem:[%s4209_s3 + $0x3a8] sm:$0xff]  ;;  %v342_v25 = vld [vmem:[%s4210_s4 + $0x50] sm:$0xff] }
  0x6b   :  { %948 = vmatmul.mubr.f32.gmra.mrb[34].mxu0 %v344_v32  ;;  %v2570_v32 = vpack.c.bf16 %v511_v29, %v510_v28  ;;  %v351_v28 = vld [vmem:[%s4210_s4 + $0x98] sm:$0xff] }
  0x6c   :  { %952 = vmatprep.mubr.f32.mxu0 %v353_v33  ;;  %v494_v33 = vld [vmem:[%s4209_s3 + $0x110] sm:$0xff] }
  0x6f   :  { %953 = vmatmul.mubr.f32.gmra.mrb[36].mxu0 %v352_v34  ;;  %v495_v34 = vld [vmem:[%s4209_s3 + $0x118] sm:$0xff] }
  0x70   :  { %957 = vmatprep.mubr.f32.mxu0 %v361_v35  ;;  %v335_v35 = vld [vmem:[%s4210_s4 + $0x18] sm:$0xff] }
  0x73   :  { %958 = vmatmul.mubr.f32.gmra.mrb[38].mxu0 %v360_v36  ;;  %v512_v36 = vld [vmem:[%s4209_s3 + $0x1a0] sm:$0xff] }
  0x74   :  { %962 = vmatprep.mubr.f32.mxu0 %v369_v37  ;;  %v513_v37 = vld [vmem:[%s4209_s3 + $0x1a8] sm:$0xff] }
  0x77   :  { %963 = vmatmul.mubr.f32.gmra.mrb[40].mxu0 %v368_v38  ;;  %v2572_v38 = vpack.c.bf16 %v495_v34, %v494_v33  ;;  %v579_v33 = vld [vmem:[%s4209_s3 + $0x3b8] sm:$0xff]  ;;  %v350_v34 = vld [vmem:[%s4210_s4 + $0x90] sm:$0xff] }
  0x78   :  { %967 = vmatprep.mubr.f32.mxu0 %v377_v39  ;;  %v2574_v39 = vpack.c.bf16 %v513_v37, %v512_v36  ;;  %v359_v36 = vld [vmem:[%s4210_s4 + $0xd8] sm:$0xff] }
  0x7b   :  { %968 = vmatmul.mubr.f32.gmra.mrb[42].mxu0 %v376_v40  ;;  %v496_v40 = vld [vmem:[%s4209_s3 + $0x120] sm:$0xff] }
  0x7c   :  { %972 = vmatprep.mubr.f32.mxu0 %v385_v41  ;;  %v497_v41 = vld [vmem:[%s4209_s3 + $0x128] sm:$0xff] }
  0x7f   :  { %973 = vmatmul.mubr.f32.gmra.mrb[44].mxu0 %v384_v42  ;;  %v514_v42 = vld [vmem:[%s4209_s3 + $0x1b0] sm:$0xff] }
  0x80   :  { %977 = vmatprep.mubr.f32.mxu0 %v393_v43  ;;  %v515_v43 = vld [vmem:[%s4209_s3 + $0x1b8] sm:$0xff] }
  0x83   :  { %978 = vmatmul.mubr.f32.gmra.mrb[46].mxu0 %v392_v44  ;;  %v2576_v44 = vpack.c.bf16 %v497_v41, %v496_v40  ;;  %v580_v40 = vld [vmem:[%s4209_s3 + $0x3c0] sm:$0xff]  ;;  %v581_v41 = vld [vmem:[%s4209_s3 + $0x3c8] sm:$0xff] }
  0x84   :  { %982 = vmatprep.mubr.f32.mxu0 %v401_v45  ;;  %v2578_v45 = vpack.c.bf16 %v515_v43, %v514_v42  ;;  %v358_v42 = vld [vmem:[%s4210_s4 + $0xd0] sm:$0xff] }
  0x87   :  { %983 = vmatmul.mubr.f32.gmra.mrb[48].mxu0 %v400_v46  ;;  %v498_v46 = vld [vmem:[%s4209_s3 + $0x130] sm:$0xff] }
  0x88   :  { %987 = vmatprep.mubr.f32.mxu0 %v409_v47  ;;  %v499_v47 = vld [vmem:[%s4209_s3 + $0x138] sm:$0xff] }
  0x8b   :  { %988 = vmatmul.mubr.f32.gmra.mrb[50].mxu0 %v408_v48  ;;  %v516_v48 = vld [vmem:[%s4209_s3 + $0x1c0] sm:$0xff] }
  0x8c   :  { %992 = vmatprep.mubr.f32.mxu0 %v417_v49  ;;  %v517_v49 = vld [vmem:[%s4209_s3 + $0x1c8] sm:$0xff] }
  0x8f   :  { %993 = vmatmul.mubr.f32.gmra.mrb[52].mxu0 %v416_v50  ;;  %v2580_v50 = vpack.c.bf16 %v499_v47, %v498_v46  ;;  %v564_v46 = vld [vmem:[%s4209_s3 + $0x340] sm:$0xff]  ;;  %v565_v47 = vld [vmem:[%s4209_s3 + $0x348] sm:$0xff] }
  0x90   :  { %997 = vmatprep.mubr.f32.mxu0 %v425_v51  ;;  %v2582_v51 = vpack.c.bf16 %v517_v49, %v516_v48  ;;  %v582_v48 = vld [vmem:[%s4209_s3 + $0x3d0] sm:$0xff]  ;;  %v583_v49 = vld [vmem:[%s4209_s3 + $0x3d8] sm:$0xff] }
  0x93   :  { %998 = vmatmul.mubr.f32.gmra.mrb[54].mxu0 %v424_v52  ;;  %v500_v52 = vld [vmem:[%s4209_s3 + $0x140] sm:$0xff] }
  0x94   :  { %1002 = vmatprep.mubr.f32.mxu0 %v433_v53  ;;  %v501_v53 = vld [vmem:[%s4209_s3 + $0x148] sm:$0xff] }
  0x97   :  { %1003 = vmatmul.mubr.f32.gmra.mrb[56].mxu0 %v432_v54  ;;  %v518_v54 = vld [vmem:[%s4209_s3 + $0x1d0] sm:$0xff] }
  0x98   :  { %1007 = vmatprep.mubr.f32.mxu0 %v441_v55  ;;  %v519_v55 = vld [vmem:[%s4209_s3 + $0x1d8] sm:$0xff] }
  0x9b   :  { %1008 = vmatmul.mubr.f32.gmra.mrb[58].mxu0 %v440_v56  ;;  %v2584_v56 = vpack.c.bf16 %v501_v53, %v500_v52  ;;  %v375_v52 = vld [vmem:[%s4210_s4 + $0x158] sm:$0xff]  ;;  %v2650_v53 = vpack.c.bf16 %v583_v49, %v582_v48 }
  0x9c   :  { %1012 = vmatprep.mubr.f32.mxu0 %v449_v57  ;;  %v2586_v57 = vpack.c.bf16 %v519_v55, %v518_v54  ;;  %v566_v54 = vld [vmem:[%s4209_s3 + $0x350] sm:$0xff]  ;;  %v567_v55 = vld [vmem:[%s4209_s3 + $0x358] sm:$0xff] }
  0x9f   :  { %1013 = vmatmul.mubr.f32.gmra.mrb[60].mxu0 %v448_v58  ;;  %v502_v58 = vld [vmem:[%s4209_s3 + $0x150] sm:$0xff] }
  0xa0   :  { %1017 = vmatprep.mubr.f32.mxu0 %v457_v59  ;;  %v503_v59 = vld [vmem:[%s4209_s3 + $0x158] sm:$0xff] }
  0xa3   :  { %1018 = vmatmul.mubr.f32.gmra.mrb[62].mxu0 %v456_v60  ;;  %v520_v60 = vld [vmem:[%s4209_s3 + $0x1e0] sm:$0xff] }
  0xa4   :  { %2428 = vmatprep.mubr.msk.f32.mxu0 %vm2780_vm1, %v2781_v26 }
  0xe3   :  { %v2363_v61 = vpop.f32.mrb[0].mxu1 }
  0xe4   :  { %v167_v62 = vpop.f32.mrb[1].mxu1 }
  0xe5   :  { %v2511_v63 = vpack.c.bf16 %v2363_v61, %v167_v62  ;;  %v521_v61 = vld [vmem:[%s4209_s3 + $0x1e8] sm:$0xff]  ;;  %v2588_v62 = vpack.c.bf16 %v503_v59, %v502_v58  ;;  %v374_v58 = vld [vmem:[%s4210_s4 + $0x150] sm:$0xff]  ;;  %v2652_v59 = vpack.c.bf16 %v567_v55, %v566_v54 }
  0xe7   :  { %v2366_v0 = vpop.f32.mrb[2].mxu1  ;;  %2512 = vmatpush3.bf16.msra.mxu1 %v2511_v63  ;;  %v2590_v63 = vpack.c.bf16 %v521_v61, %v520_v60  ;;  %v383_v60 = vld [vmem:[%s4210_s4 + $0x198] sm:$0xff] }
  0xe8   :  { %v177_v1 = vpop.f32.mrb[3].mxu1  ;;  %2513 = vmatprep.subr.bf16.mxu1 %v2779_v9 }
  0xe9   :  { %v2514_v2 = vpack.c.bf16 %v2366_v0, %v177_v1  ;;  %v504_v0 = vld [vmem:[%s4209_s3 + $0x160] sm:$0xff]  ;;  %v505_v1 = vld [vmem:[%s4209_s3 + $0x168] sm:$0xff] }
  0xeb   :  { %v2369_v3 = vpop.f32.mrb[4].mxu1  ;;  %2515 = vmatpush3.bf16.msra.mxu1 %v2514_v2  ;;  %v522_v2 = vld [vmem:[%s4209_s3 + $0x1f0] sm:$0xff] }
  0xec   :  { %v187_v4 = vpop.f32.mrb[5].mxu1  ;;  %2516 = vmatprep.subr.bf16.mxu1 %v2779_v9 }
  0xed   :  { %v2517_v5 = vpack.c.bf16 %v2369_v3, %v187_v4  ;;  %v523_v3 = vld [vmem:[%s4209_s3 + $0x1f8] sm:$0xff]  ;;  %v2592_v4 = vpack.c.bf16 %v505_v1, %v504_v0  ;;  %v586_v0 = vld [vmem:[%s4209_s3 + $0x3f0] sm:$0xff] }
  0xee   :  { %v587_v1 = vld [vmem:[%s4209_s3 + $0x3f8] sm:$0xff] }
  0xef   :  { %v2372_v6 = vpop.f32.mrb[6].mxu1  ;;  %2518 = vmatpush3.bf16.msra.mxu1 %v2517_v5  ;;  %v2594_v5 = vpack.c.bf16 %v523_v3, %v522_v2  ;;  %v382_v2 = vld [vmem:[%s4210_s4 + $0x190] sm:$0xff] }
  0xf0   :  { %v197_v7 = vpop.f32.mrb[7].mxu1  ;;  %2519 = vmatprep.subr.bf16.mxu1 %v2779_v9 }
  0xf1   :  { %v2520_v8 = vpack.c.bf16 %v2372_v6, %v197_v7  ;;  %v506_v6 = vld [vmem:[%s4209_s3 + $0x170] sm:$0xff]  ;;  %v507_v7 = vld [vmem:[%s4209_s3 + $0x178] sm:$0xff] }
  0xf3   :  { %v2375_v10 = vpop.f32.mrb[8].mxu1  ;;  %2521 = vmatpush3.bf16.msra.mxu1 %v2520_v8  ;;  %v572_v8 = vld [vmem:[%s4209_s3 + $0x380] sm:$0xff] }
  0xf4   :  { %v207_v11 = vpop.f32.mrb[9].mxu1  ;;  %2522 = vmatprep.subr.bf16.mxu1 %v2779_v9 }
  0xf5   :  { %v2523_v12 = vpack.c.bf16 %v2375_v10, %v207_v11  ;;  %v573_v10 = vld [vmem:[%s4209_s3 + $0x388] sm:$0xff]  ;;  %v2596_v11 = vpack.c.bf16 %v507_v7, %v506_v6  ;;  %v570_v6 = vld [vmem:[%s4209_s3 + $0x370] sm:$0xff]  ;;  %v571_v7 = vld [vmem:[%s4209_s3 + $0x378] sm:$0xff] }
  0xf7   :  { %v2378_v13 = vpop.f32.mrb[10].mxu1  ;;  %2524 = vmatpush3.bf16.msra.mxu1 %v2523_v12  ;;  %v2630_v12 = vpack.c.bf16 %v573_v10, %v572_v8  ;;  %v390_v8 = vld [vmem:[%s4210_s4 + $0x1d0] sm:$0xff]  ;;  %v2660_v10 = vpack.c.bf16 %v571_v7, %v570_v6 }
  0xf8   :  { %v217_v14 = vpop.f32.mrb[11].mxu1  ;;  %2525 = vmatprep.subr.bf16.mxu1 %v2779_v9 }
  0xf9   :  { %v2526_v15 = vpack.c.bf16 %v2378_v13, %v217_v14  ;;  %v556_v13 = vld [vmem:[%s4209_s3 + $0x300] sm:$0xff]  ;;  %v557_v14 = vld [vmem:[%s4209_s3 + $0x308] sm:$0xff] }
  0xfb   :  { %v2381_v16 = vpop.f32.mrb[12].mxu1  ;;  %2527 = vmatpush3.bf16.msra.mxu1 %v2526_v15  ;;  %v574_v15 = vld [vmem:[%s4209_s3 + $0x390] sm:$0xff] }
  0xfc   :  { %v227_v17 = vpop.f32.mrb[13].mxu1  ;;  %2528 = vmatprep.subr.bf16.mxu1 %v2779_v9 }
  0xfd   :  { %v2529_v18 = vpack.c.bf16 %v2381_v16, %v227_v17  ;;  %v575_v16 = vld [vmem:[%s4209_s3 + $0x398] sm:$0xff]  ;;  %v334_v17 = vld [vmem:[%s4210_s4 + $0x10] sm:$0xff] }
  0xfe   :  { %v2634_v20 = vpack.c.bf16 %v575_v16, %v574_v15  ;;  %v415_v15 = vld [vmem:[%s4210_s4 + $0x298] sm:$0xff]  ;;  %v414_v16 = vld [vmem:[%s4210_s4 + $0x290] sm:$0xff] }
  0xff   :  { %v2384_v21 = vpop.f32.mrb[14].mxu1  ;;  %2530 = vmatpush3.bf16.msra.mxu1 %v2529_v18  ;;  %v2632_v18 = vpack.c.bf16 %v557_v14, %v556_v13  ;;  %v407_v13 = vld [vmem:[%s4210_s4 + $0x258] sm:$0xff]  ;;  %v406_v14 = vld [vmem:[%s4210_s4 + $0x250] sm:$0xff] }
 0x100   :  { %v237_v22 = vpop.f32.mrb[15].mxu1  ;;  %2531 = vmatprep.subr.bf16.mxu1 %v2779_v9 }
 0x101   :  { %v2532_v27 = vpack.c.bf16 %v2384_v21, %v237_v22  ;;  %v558_v21 = vld [vmem:[%s4209_s3 + $0x310] sm:$0xff]  ;;  %v559_v22 = vld [vmem:[%s4209_s3 + $0x318] sm:$0xff] }
 0x103   :  { %2533 = vmatpush3.bf16.msra.mxu1 %v2532_v27  ;;  %v2636_v27 = vpack.c.bf16 %v559_v22, %v558_v21  ;;  %v439_v21 = vld [vmem:[%s4210_s4 + $0x358] sm:$0xff]  ;;  %v438_v22 = vld [vmem:[%s4210_s4 + $0x350] sm:$0xff] }
 0x104   :  { %2567 = vmatprep.subr.bf16.mxu1 %v2566_v23  ;;  %v576_v23 = vld [vmem:[%s4209_s3 + $0x3a0] sm:$0xff] }
 0x105   :  { %v2638_v29 = vpack.c.bf16 %v577_v24, %v576_v23  ;;  %v447_v23 = vld [vmem:[%s4210_s4 + $0x398] sm:$0xff]  ;;  %v2019_v24 = vpop.f32.mrb[0].mxu0 }
 0x106   :  { %2418 = vmatmul.mubr.f32.vlgmr.msra.gmra.mrb[16].mxu1 %v246_v30  ;;  %v560_v30 = vld [vmem:[%s4209_s3 + $0x320] sm:$0xff] }
 0x107   :  { %2569 = vmatpush3.bf16.msra.mxu1 %v2568_v31  ;;  %797 = vmatprep.mubr.f32.mxu1 %v335_v35  ;;  %v561_v31 = vld [vmem:[%s4209_s3 + $0x328] sm:$0xff] }
 0x108   :  { %2571 = vmatprep.subr.bf16.mxu1 %v2570_v32  ;;  %v578_v32 = vld [vmem:[%s4209_s3 + $0x3b0] sm:$0xff]  ;;  %v2640_v35 = vpack.c.bf16 %v561_v31, %v560_v30 }
 0x109   :  { %v2642_v37 = vpack.c.bf16 %v579_v33, %v578_v32 }
 0x10b   :  { %2573 = vmatpush3.bf16.msra.mxu1 %v2572_v38  ;;  %v562_v38 = vld [vmem:[%s4209_s3 + $0x330] sm:$0xff] }
 0x10c   :  { %2575 = vmatprep.subr.bf16.mxu1 %v2574_v39  ;;  %v563_v39 = vld [vmem:[%s4209_s3 + $0x338] sm:$0xff] }
 0x10d   :  { %v2644_v43 = vpack.c.bf16 %v563_v39, %v562_v38 }
 0x10f   :  { %2577 = vmatpush3.bf16.msra.mxu1 %v2576_v44  ;;  %v367_v44 = vld [vmem:[%s4210_s4 + $0x118] sm:$0xff] }
 0x110   :  { %2579 = vmatprep.subr.bf16.mxu1 %v2578_v45  ;;  %v2646_v45 = vpack.c.bf16 %v581_v41, %v580_v40 }
 0x113   :  { %2581 = vmatpush3.bf16.msra.mxu1 %v2580_v50  ;;  %v366_v50 = vld [vmem:[%s4210_s4 + $0x110] sm:$0xff] }
 0x114   :  { %2583 = vmatprep.subr.bf16.mxu1 %v2582_v51  ;;  %v2648_v51 = vpack.c.bf16 %v565_v47, %v564_v46 }
 0x117   :  { %2585 = vmatpush3.bf16.msra.mxu1 %v2584_v56  ;;  %v584_v56 = vld [vmem:[%s4209_s3 + $0x3e0] sm:$0xff] }
 0x118   :  { %2587 = vmatprep.subr.bf16.mxu1 %v2586_v57  ;;  %v585_v57 = vld [vmem:[%s4209_s3 + $0x3e8] sm:$0xff] }
 0x119   :  { %v2654_v61 = vpack.c.bf16 %v585_v57, %v584_v56 }
 0x11b   :  { %2589 = vmatpush3.bf16.msra.mxu1 %v2588_v62  ;;  %v568_v62 = vld [vmem:[%s4209_s3 + $0x360] sm:$0xff] }
 0x11c   :  { %2591 = vmatprep.subr.bf16.mxu1 %v2590_v63  ;;  %v569_v63 = vld [vmem:[%s4209_s3 + $0x368] sm:$0xff] }
 0x11d   :  { %v2656_v3 = vpack.c.bf16 %v569_v63, %v568_v62 }
 0x11f   :  { %2593 = vmatpush3.bf16.msra.mxu1 %v2592_v4  ;;  %v391_v4 = vld [vmem:[%s4210_s4 + $0x1d8] sm:$0xff] }
 0x120   :  { %2595 = vmatprep.subr.bf16.mxu1 %v2594_v5  ;;  %v2658_v5 = vpack.c.bf16 %v587_v1, %v586_v0 }
 0x123   :  { %2597 = vmatpush3.bf16.msra.mxu1 %v2596_v11  ;;  %v399_v11 = vld [vmem:[%s4210_s4 + $0x218] sm:$0xff] }
 0x124   :  { %2631 = vmatprep.subr.bf16.mxu1 %v2630_v12  ;;  %v398_v12 = vld [vmem:[%s4210_s4 + $0x210] sm:$0xff] }
 0x126   :  { %798 = vmatmul.mubr.f32.vlgmr.msra.gmra.mrb[18].mxu1 %v334_v17  ;;  %v423_v17 = vld [vmem:[%s4210_s4 + $0x2d8] sm:$0xff] }
 0x127   :  { %2633 = vmatpush3.bf16.msra.mxu1 %v2632_v18  ;;  %802 = vmatprep.mubr.f32.mxu1 %v343_v19  ;;  %v422_v18 = vld [vmem:[%s4210_s4 + $0x2d0] sm:$0xff]  ;;  %v431_v19 = vld [vmem:[%s4210_s4 + $0x318] sm:$0xff] }
 0x128   :  { %2635 = vmatprep.subr.bf16.mxu1 %v2634_v20  ;;  %v430_v20 = vld [vmem:[%s4210_s4 + $0x310] sm:$0xff] }
 0x12a   :  { %803 = vmatmul.mubr.f32.gmra.mrb[20].mxu1 %v342_v25  ;;  %v446_v25 = vld [vmem:[%s4210_s4 + $0x390] sm:$0xff] }
 0x12b   :  { %807 = vmatprep.mubr.f32.mxu1 %v351_v28  ;;  %2637 = vmatpush3.bf16.msra.mxu1 %v2636_v27  ;;  %v2020_v27 = vpop.f32.mrb[1].mxu0  ;;  %v455_v28 = vld [vmem:[%s4210_s4 + $0x3d8] sm:$0xff] }
 0x12c   :  { %2639 = vmatprep.subr.bf16.mxu1 %v2638_v29  ;;  %v3595_v29 = vadd.f32 %v2020_v27, %v2019_v24  ;;  %v2022_v30 = vpop.f32.mrb[2].mxu0  ;;  %v386_v27 = vld [vmem:[%s4210_s4 + $0x1b0] sm:$0xff] }
 0x12d   :  { %v2023_v31 = vpop.f32.mrb[3].mxu0 }
 0x12e   :  { %808 = vmatmul.mubr.f32.gmra.mrb[22].mxu1 %v350_v34  ;;  %v3597_v32 = vadd.f32 %v2023_v31, %v2022_v30  ;;  %v2025_v33 = vpop.f32.mrb[4].mxu0  ;;  %v454_v34 = vld [vmem:[%s4210_s4 + $0x3d0] sm:$0xff]  ;;  %v395_v30 = vld [vmem:[%s4210_s4 + $0x1f8] sm:$0xff] }
 0x12f   :  { %812 = vmatprep.mubr.f32.mxu1 %v359_v36  ;;  %2641 = vmatpush3.bf16.msra.mxu1 %v2640_v35  ;;  %v2026_v35 = vpop.f32.mrb[5].mxu0  ;;  %v339_v36 = vld [vmem:[%s4210_s4 + $0x38] sm:$0xff] }
 0x130   :  { %2643 = vmatprep.subr.bf16.mxu1 %v2642_v37  ;;  %v3605_v37 = vadd.f32 %v2026_v35, %v2025_v33  ;;  %v2028_v38 = vpop.f32.mrb[6].mxu0 }
 0x131   :  { %v2029_v39 = vpop.f32.mrb[7].mxu0 }
 0x132   :  { %813 = vmatmul.mubr.f32.gmra.mrb[24].mxu1 %v358_v42  ;;  %v3607_v40 = vadd.f32 %v2029_v39, %v2028_v38  ;;  %v2031_v41 = vpop.f32.mrb[8].mxu0  ;;  %v338_v42 = vld [vmem:[%s4210_s4 + $0x30] sm:$0xff] }
 0x133   :  { %817 = vmatprep.mubr.f32.mxu1 %v367_v44  ;;  %2645 = vmatpush3.bf16.msra.mxu1 %v2644_v43  ;;  %v2032_v43 = vpop.f32.mrb[9].mxu0  ;;  %v347_v44 = vld [vmem:[%s4210_s4 + $0x78] sm:$0xff] }
 0x134   :  { %2647 = vmatprep.subr.bf16.mxu1 %v2646_v45  ;;  %v3615_v45 = vadd.f32 %v2032_v43, %v2031_v41  ;;  %v2034_v46 = vpop.f32.mrb[10].mxu0  ;;  %v402_v41 = vld [vmem:[%s4210_s4 + $0x230] sm:$0xff]  ;;  %v411_v43 = vld [vmem:[%s4210_s4 + $0x278] sm:$0xff] }
 0x135   :  { %v2035_v47 = vpop.f32.mrb[11].mxu0 }
 0x136   :  { %818 = vmatmul.mubr.f32.gmra.mrb[26].mxu1 %v366_v50  ;;  %v3617_v48 = vadd.f32 %v2035_v47, %v2034_v46  ;;  %v2037_v49 = vpop.f32.mrb[12].mxu0  ;;  %v346_v50 = vld [vmem:[%s4210_s4 + $0x70] sm:$0xff] }
 0x137   :  { %822 = vmatprep.mubr.f32.mxu1 %v375_v52  ;;  %2649 = vmatpush3.bf16.msra.mxu1 %v2648_v51  ;;  %v2038_v51 = vpop.f32.mrb[13].mxu0  ;;  %v355_v52 = vld [vmem:[%s4210_s4 + $0xb8] sm:$0xff]  ;;  %v410_v47 = vld [vmem:[%s4210_s4 + $0x270] sm:$0xff] }
 0x138   :  { %2651 = vmatprep.subr.bf16.mxu1 %v2650_v53  ;;  %v3625_v53 = vadd.f32 %v2038_v51, %v2037_v49  ;;  %v2040_v54 = vpop.f32.mrb[14].mxu0 }
 0x139   :  { %v2041_v55 = vpop.f32.mrb[15].mxu0 }
 0x13a   :  { %823 = vmatmul.mubr.f32.gmra.mrb[28].mxu1 %v374_v58  ;;  %v3627_v56 = vadd.f32 %v2041_v55, %v2040_v54  ;;  %v2043_v57 = vpop.f32.mrb[16].mxu0  ;;  %v354_v58 = vld [vmem:[%s4210_s4 + $0xb0] sm:$0xff] }
 0x13b   :  { %827 = vmatprep.mubr.f32.mxu1 %v383_v60  ;;  %2653 = vmatpush3.bf16.msra.mxu1 %v2652_v59  ;;  %v2044_v59 = vpop.f32.mrb[17].mxu0  ;;  %v363_v60 = vld [vmem:[%s4210_s4 + $0xf8] sm:$0xff]  ;;  %v418_v54 = vld [vmem:[%s4210_s4 + $0x2b0] sm:$0xff] }
 0x13c   :  { %2655 = vmatprep.subr.bf16.mxu1 %v2654_v61  ;;  %v3635_v61 = vadd.f32 %v2044_v59, %v2043_v57  ;;  %v2046_v62 = vpop.f32.mrb[18].mxu0  ;;  %v427_v57 = vld [vmem:[%s4210_s4 + $0x2f8] sm:$0xff] }
 0x13d   :  { %v2047_v63 = vpop.f32.mrb[19].mxu0 }
 0x13e   :  { %828 = vmatmul.mubr.f32.gmra.mrb[30].mxu1 %v382_v2  ;;  %v3637_v0 = vadd.f32 %v2047_v63, %v2046_v62  ;;  %v2049_v1 = vpop.f32.mrb[20].mxu0  ;;  %v362_v2 = vld [vmem:[%s4210_s4 + $0xf0] sm:$0xff]  ;;  %v435_v63 = vld [vmem:[%s4210_s4 + $0x338] sm:$0xff] }
 0x13f   :  { %832 = vmatprep.mubr.f32.mxu1 %v391_v4  ;;  %2657 = vmatpush3.bf16.msra.mxu1 %v2656_v3  ;;  %v2050_v3 = vpop.f32.mrb[21].mxu0  ;;  %v371_v4 = vld [vmem:[%s4210_s4 + $0x138] sm:$0xff] }
 0x140   :  { %2659 = vmatprep.subr.bf16.mxu1 %v2658_v5  ;;  %v3645_v5 = vadd.f32 %v2050_v3, %v2049_v1  ;;  %v2052_v6 = vpop.f32.mrb[22].mxu0  ;;  %v434_v3 = vld [vmem:[%s4210_s4 + $0x330] sm:$0xff] }
 0x141   :  { %v2053_v7 = vpop.f32.mrb[23].mxu0 }
 0x142   :  { %833 = vmatmul.mubr.f32.gmra.mrb[32].mxu1 %v390_v8  ;;  %v3647_v8 = vadd.f32 %v2053_v7, %v2052_v6  ;;  %v443_v6 = vld [vmem:[%s4210_s4 + $0x378] sm:$0xff] }
 0x143   :  { %837 = vmatprep.mubr.f32.mxu1 %v399_v11  ;;  %2661 = vmatpush3.bf16.msra.mxu1 %v2660_v10  ;;  %v2055_v10 = vpop.f32.mrb[24].mxu0  ;;  %v370_v11 = vld [vmem:[%s4210_s4 + $0x130] sm:$0xff] }
 0x144   :  { %2676 = vmatprep.subr.bf16.mxu1 %v2779_v9 }
 0x146   :  { %838 = vmatmul.mubr.f32.gmra.mrb[34].mxu1 %v398_v12  ;;  %v2056_v12 = vpop.f32.mrb[25].mxu0 }
 0x147   :  { %842 = vmatprep.mubr.f32.mxu1 %v407_v13  ;;  %v379_v13 = vld [vmem:[%s4210_s4 + $0x178] sm:$0xff] }
 0x14a   :  { %843 = vmatmul.mubr.f32.gmra.mrb[36].mxu1 %v406_v14  ;;  %v3655_v14 = vadd.f32 %v2056_v12, %v2055_v10 }
 0x14b   :  { %847 = vmatprep.mubr.f32.mxu1 %v415_v15  ;;  %v2058_v15 = vpop.f32.mrb[26].mxu0 }
 0x14e   :  { %848 = vmatmul.mubr.f32.gmra.mrb[38].mxu1 %v414_v16  ;;  %v2059_v16 = vpop.f32.mrb[27].mxu0 }
 0x14f   :  { %852 = vmatprep.mubr.f32.mxu1 %v423_v17  ;;  %v3657_v17 = vadd.f32 %v2059_v16, %v2058_v15 }
 0x152   :  { %853 = vmatmul.mubr.f32.gmra.mrb[40].mxu1 %v422_v18  ;;  %v2061_v18 = vpop.f32.mrb[28].mxu0 }
 0x153   :  { %857 = vmatprep.mubr.f32.mxu1 %v431_v19  ;;  %v378_v19 = vld [vmem:[%s4210_s4 + $0x170] sm:$0xff] }
 0x156   :  { %858 = vmatmul.mubr.f32.gmra.mrb[42].mxu1 %v430_v20  ;;  %v2062_v20 = vpop.f32.mrb[29].mxu0 }
 0x157   :  { %862 = vmatprep.mubr.f32.mxu1 %v439_v21  ;;  %v387_v21 = vld [vmem:[%s4210_s4 + $0x1b8] sm:$0xff] }
 0x15a   :  { %863 = vmatmul.mubr.f32.gmra.mrb[44].mxu1 %v438_v22  ;;  %v3665_v22 = vadd.f32 %v2062_v20, %v2061_v18  ;;  %v450_v18 = vld [vmem:[%s4210_s4 + $0x3b0] sm:$0xff]  ;;  %v459_v20 = vld [vmem:[%s4210_s4 + $0x3f8] sm:$0xff] }
 0x15b   :  { %867 = vmatprep.mubr.f32.mxu1 %v447_v23  ;;  %v2064_v23 = vpop.f32.mrb[30].mxu0 }
 0x15c   :  { %v2065_v24 = vpop.f32.mrb[31].mxu0 }
 0x15e   :  { %868 = vmatmul.mubr.f32.gmra.mrb[46].mxu1 %v446_v25  ;;  %v3667_v25 = vadd.f32 %v2065_v24, %v2064_v23  ;;  %v458_v24 = vld [vmem:[%s4210_s4 + $0x3f0] sm:$0xff] }
 0x15f   :  { %872 = vmatprep.mubr.f32.mxu1 %v455_v28  ;;  %v2179_v28 = vpop.f32.mrb[32].mxu0 }
 0x160   :  { %v2180_v31 = vpop.f32.mrb[33].mxu0 }
 0x161   :  { %v3675_v33 = vadd.f32 %v2180_v31, %v2179_v28  ;;  %v2182_v35 = vpop.f32.mrb[34].mxu0 }
 0x162   :  { %873 = vmatmul.mubr.f32.gmra.mrb[48].mxu1 %v454_v34  ;;  %v394_v34 = vld [vmem:[%s4210_s4 + $0x1f0] sm:$0xff]  ;;  %v2183_v38 = vpop.f32.mrb[35].mxu0 }
 0x163   :  { %1087 = vmatprep.mubr.f32.mxu1 %v339_v36  ;;  %v403_v36 = vld [vmem:[%s4210_s4 + $0x238] sm:$0xff]  ;;  %v3683_v39 = vadd.f32 %v2183_v38, %v2182_v35 }
 0x166   :  { %1088 = vmatmul.mubr.f32.vlgmr.msra.gmra.mrb[50].mxu1 %v338_v42  ;;  %v2185_v42 = vpop.f32.mrb[36].mxu0 }
 0x167   :  { %1092 = vmatprep.mubr.f32.mxu1 %v347_v44  ;;  %v2186_v44 = vpop.f32.mrb[37].mxu0 }
 0x168   :  { %v3691_v46 = vadd.f32 %v2186_v44, %v2185_v42  ;;  %v2188_v49 = vpop.f32.mrb[38].mxu0 }
 0x169   :  { %v2189_v51 = vpop.f32.mrb[39].mxu0 }
 0x16a   :  { %1093 = vmatmul.mubr.f32.gmra.mrb[52].mxu1 %v346_v50  ;;  %v419_v50 = vld [vmem:[%s4210_s4 + $0x2b8] sm:$0xff]  ;;  %v2191_v55 = vpop.f32.mrb[40].mxu0 }
 0x16b   :  { %1097 = vmatprep.mubr.f32.mxu1 %v355_v52  ;;  %v3699_v52 = vadd.f32 %v2189_v51, %v2188_v49 }
 0x16e   :  { %1098 = vmatmul.mubr.f32.gmra.mrb[54].mxu1 %v354_v58  ;;  %v2192_v58 = vpop.f32.mrb[41].mxu0 }
 0x16f   :  { %1102 = vmatprep.mubr.f32.mxu1 %v363_v60  ;;  %v3707_v59 = vadd.f32 %v2192_v58, %v2191_v55  ;;  %v426_v60 = vld [vmem:[%s4210_s4 + $0x2f0] sm:$0xff]  ;;  %v2194_v62 = vpop.f32.mrb[42].mxu0 }
 0x170   :  { %v2195_v1 = vpop.f32.mrb[43].mxu0 }
 0x172   :  { %1103 = vmatmul.mubr.f32.gmra.mrb[56].mxu1 %v362_v2  ;;  %v3715_v2 = vadd.f32 %v2195_v1, %v2194_v62 }
 0x173   :  { %1107 = vmatprep.mubr.f32.mxu1 %v371_v4  ;;  %v2197_v4 = vpop.f32.mrb[44].mxu0 }
 0x174   :  { %v2198_v7 = vpop.f32.mrb[45].mxu0 }
 0x175   :  { %v3723_v10 = vadd.f32 %v2198_v7, %v2197_v4  ;;  %v2200_v12 = vpop.f32.mrb[46].mxu0 }
 0x176   :  { %1108 = vmatmul.mubr.f32.gmra.mrb[58].mxu1 %v370_v11  ;;  %v442_v11 = vld [vmem:[%s4210_s4 + $0x370] sm:$0xff]  ;;  %v2201_v15 = vpop.f32.mrb[47].mxu0 }
 0x177   :  { %1112 = vmatprep.mubr.f32.mxu1 %v379_v13  ;;  %v451_v13 = vld [vmem:[%s4210_s4 + $0x3b8] sm:$0xff]  ;;  %v3731_v16 = vadd.f32 %v2201_v15, %v2200_v12 }
 0x17a   :  { %1113 = vmatmul.mubr.f32.gmra.mrb[60].mxu1 %v378_v19  ;;  %v2203_v19 = vpop.f32.mrb[48].mxu0 }
 0x17b   :  { %1117 = vmatprep.mubr.f32.mxu1 %v387_v21  ;;  %v2204_v21 = vpop.f32.mrb[49].mxu0 }
 0x17c   :  { %v3739_v23 = vadd.f32 %v2204_v21, %v2203_v19 }
 0x17e   :  { %1118 = vmatmul.mubr.f32.gmra.mrb[62].mxu1 %v386_v27  ;;  %v2206_v27 = vpop.f32.mrb[50].mxu0 }
 0x17f   :  { %1122 = vmatprep.mubr.f32.mxu1 %v395_v30  ;;  %v2207_v28 = vpop.f32.mrb[51].mxu0 }
 0x180   :  { %v3744_v30 = vadd.f32 %v2207_v28, %v2206_v27  ;;  %v2209_v31 = vpop.f32.mrb[52].mxu0 }
 0x182   :  { %1123 = vmatmul.mubr.f32.gmra.mrb[64].mxu1 %v394_v34  ;;  %v2210_v34 = vpop.f32.mrb[53].mxu0 }
 0x183   :  { %1127 = vmatprep.mubr.f32.mxu1 %v403_v36  ;;  %v3748_v35 = vadd.f32 %v2210_v34, %v2209_v31  ;;  %v2212_v36 = vpop.f32.mrb[54].mxu0 }
 0x184   :  { %v2213_v38 = vpop.f32.mrb[55].mxu0 }
 0x185   :  { %v2215_v42 = vpop.f32.mrb[56].mxu0 }
 0x186   :  { %1128 = vmatmul.mubr.f32.gmra.mrb[66].mxu1 %v402_v41  ;;  %v3750_v41 = vadd.f32 %v2213_v38, %v2212_v36 }
 0x187   :  { %1132 = vmatprep.mubr.f32.mxu1 %v411_v43  ;;  %v2216_v43 = vpop.f32.mrb[57].mxu0 }
 0x188   :  { %v3752_v44 = vadd.f32 %v2216_v43, %v2215_v42 }
 0x18a   :  { %1133 = vmatmul.mubr.f32.gmra.mrb[68].mxu1 %v410_v47  ;;  %v2218_v47 = vpop.f32.mrb[58].mxu0 }
 0x18b   :  { %1137 = vmatprep.mubr.f32.mxu1 %v419_v50  ;;  %v2219_v49 = vpop.f32.mrb[59].mxu0 }
 0x18c   :  { %v3754_v50 = vadd.f32 %v2219_v49, %v2218_v47  ;;  %v2221_v51 = vpop.f32.mrb[60].mxu0 }
 0x18e   :  { %1138 = vmatmul.mubr.f32.gmra.mrb[70].mxu1 %v418_v54  ;;  %v2222_v54 = vpop.f32.mrb[61].mxu0 }
 0x18f   :  { %1142 = vmatprep.mubr.f32.mxu1 %v427_v57  ;;  %v3756_v55 = vadd.f32 %v2222_v54, %v2221_v51 }
 0x192   :  { %1143 = vmatmul.mubr.f32.gmra.mrb[72].mxu1 %v426_v60 }
 0x193   :  { %1147 = vmatprep.mubr.f32.mxu1 %v435_v63 }
 0x196   :  { %1148 = vmatmul.mubr.f32.gmra.mrb[74].mxu1 %v434_v3 }
 0x197   :  { %1152 = vmatprep.mubr.f32.mxu1 %v443_v6 }
 0x19a   :  { %1153 = vmatmul.mubr.f32.gmra.mrb[76].mxu1 %v442_v11 }
 0x19b   :  { %1157 = vmatprep.mubr.f32.mxu1 %v451_v13 }
 0x19e   :  { %1158 = vmatmul.mubr.f32.gmra.mrb[78].mxu1 %v450_v18 }
 0x19f   :  { %1162 = vmatprep.mubr.f32.mxu1 %v459_v20 }
 0x1a2   :  { %1163 = vmatmul.mubr.f32.gmra.mrb[80].mxu1 %v458_v24 }
 0x1a3   :  { %2495 = vmatprep.mubr.msk.f32.mxu1 %vm2780_vm1, %v2781_v26  ;;  %v2224_v26 = vpop.f32.mrb[62].mxu0 }
 0x1a4   :  { %v2225_v57 = vpop.f32.mrb[63].mxu0 }
 0x1a5   :  { %v3758_v58 = vadd.f32 %v2225_v57, %v2224_v26 }
 0x1d9   :  { %v3760_v60 = vpop.f32.mrb[16].mxu1 }
 0x1da   :  { %v2419_v62 = vpop.f32.mrb[17].mxu1  ;;  %v318_v63 = vsel %vm317_vm2, %v3760_v60, 0.0 }
 0x1db   :  { %319 = vadd.xlane.f32.xlu0 %v318_v63 }
 0x1f9   :  { %v2099_v1 = vpop.f32.mrb[18].mxu1 }
 0x1fa   :  { %v2100_v3 = vpop.f32.mrb[19].mxu1 }
 0x1fb   :  { %v2101_v4 = vadd.f32 %v2100_v3, %v2099_v1 }
 0x1fd   :  { %v800_v6 = vadd.f32 %v2101_v4, %v3595_v29  ;;  %v2102_v7 = vpop.f32.mrb[20].mxu1 }
 0x1fe   :  { %v2103_v11 = vpop.f32.mrb[21].mxu1 }
 0x1ff   :  { %v3766_v12 = vadd.f32 %v3675_v33, %v800_v6  ;;  %v2104_v13 = vadd.f32 %v2103_v11, %v2102_v7 }
 0x201   :  { %v805_v15 = vadd.f32 %v2104_v13, %v3597_v32  ;;  %v2105_v18 = vpop.f32.mrb[22].mxu1 }
 0x202   :  { %v2106_v19 = vpop.f32.mrb[23].mxu1 }
 0x203   :  { %v3770_v20 = vadd.f32 %v3683_v39, %v805_v15  ;;  %v2107_v21 = vadd.f32 %v2106_v19, %v2105_v18 }
 0x205   :  { %v810_v24 = vadd.f32 %v2107_v21, %v3605_v37  ;;  %v2108_v27 = vpop.f32.mrb[24].mxu1 }
 0x206   :  { %v2109_v28 = vpop.f32.mrb[25].mxu1 }
 0x207   :  { %v3774_v29 = vadd.f32 %v3691_v46, %v810_v24  ;;  %v2110_v31 = vadd.f32 %v2109_v28, %v2108_v27 }
 0x209   :  { %v815_v33 = vadd.f32 %v2110_v31, %v3607_v40  ;;  %v2111_v34 = vpop.f32.mrb[26].mxu1 }
 0x20a   :  { %v2112_v36 = vpop.f32.mrb[27].mxu1 }
 0x20b   :  { %v3778_v32 = vadd.f32 %v3699_v52, %v815_v33  ;;  %v2113_v38 = vadd.f32 %v2112_v36, %v2111_v34 }
 0x20d   :  { %v820_v39 = vadd.f32 %v2113_v38, %v3615_v45  ;;  %v2114_v42 = vpop.f32.mrb[28].mxu1 }
 0x20e   :  { %v2115_v43 = vpop.f32.mrb[29].mxu1 }
 0x20f   :  { %v3782_v37 = vadd.f32 %v3707_v59, %v820_v39  ;;  %v2116_v47 = vadd.f32 %v2115_v43, %v2114_v42 }
 0x211   :  { %v825_v46 = vadd.f32 %v2116_v47, %v3617_v48  ;;  %v2117_v49 = vpop.f32.mrb[30].mxu1 }
 0x212   :  { %v2118_v51 = vpop.f32.mrb[31].mxu1 }
 0x213   :  { %v3786_v40 = vadd.f32 %v3715_v2, %v825_v46  ;;  %v2119_v54 = vadd.f32 %v2118_v51, %v2117_v49 }
 0x215   :  { %v830_v52 = vadd.f32 %v2119_v54, %v3625_v53  ;;  %v2120_v26 = vpop.f32.mrb[32].mxu1 }
 0x216   :  { %v2121_v57 = vpop.f32.mrb[33].mxu1 }
 0x217   :  { %v3790_v45 = vadd.f32 %v3723_v10, %v830_v52  ;;  %v2122_v62 = vadd.f32 %v2121_v57, %v2120_v26 }
 0x219   :  { %v835_v59 = vadd.f32 %v2122_v62, %v3627_v56  ;;  %v2123_v63 = vpop.f32.mrb[34].mxu1 }
 0x21a   :  { %v2124_v1 = vpop.f32.mrb[35].mxu1 }
 0x21b   :  { %v3794_v48 = vadd.f32 %v3731_v16, %v835_v59  ;;  %v2125_v3 = vadd.f32 %v2124_v1, %v2123_v63 }
 0x21d   :  { %v840_v2 = vadd.f32 %v2125_v3, %v3635_v61  ;;  %v2126_v4 = vpop.f32.mrb[36].mxu1 }
 0x21e   :  { %v2127_v6 = vpop.f32.mrb[37].mxu1 }
 0x21f   :  { %v3798_v53 = vadd.f32 %v3739_v23, %v840_v2  ;;  %v2128_v7 = vadd.f32 %v2127_v6, %v2126_v4 }
 0x221   :  { %v845_v10 = vadd.f32 %v2128_v7, %v3637_v0  ;;  %v2129_v11 = vpop.f32.mrb[38].mxu1 }
 0x222   :  { %v2130_v13 = vpop.f32.mrb[39].mxu1 }
 0x223   :  { %v3802_v56 = vadd.f32 %v3744_v30, %v845_v10  ;;  %v2131_v15 = vadd.f32 %v2130_v13, %v2129_v11 }
 0x225   :  { %v850_v16 = vadd.f32 %v2131_v15, %v3645_v5  ;;  %v2132_v18 = vpop.f32.mrb[40].mxu1 }
 0x226   :  { %v2133_v19 = vpop.f32.mrb[41].mxu1 }
 0x227   :  { %v3806_v61 = vadd.f32 %v3748_v35, %v850_v16  ;;  %v2134_v21 = vadd.f32 %v2133_v19, %v2132_v18 }
 0x229   :  { %v855_v23 = vadd.f32 %v2134_v21, %v3647_v8  ;;  %v2135_v24 = vpop.f32.mrb[42].mxu1 }
 0x22a   :  { %v2136_v27 = vpop.f32.mrb[43].mxu1 }
 0x22b   :  { %v3810_v0 = vadd.f32 %v3750_v41, %v855_v23  ;;  %v2137_v28 = vadd.f32 %v2136_v27, %v2135_v24 }
 0x22d   :  { %v860_v30 = vadd.f32 %v2137_v28, %v3655_v14  ;;  %v2138_v31 = vpop.f32.mrb[44].mxu1 }
 0x22e   :  { %v2139_v33 = vpop.f32.mrb[45].mxu1 }
 0x22f   :  { %v3814_v5 = vadd.f32 %v3752_v44, %v860_v30  ;;  %v2140_v34 = vadd.f32 %v2139_v33, %v2138_v31 }
 0x231   :  { %v865_v35 = vadd.f32 %v2140_v34, %v3657_v17  ;;  %v2141_v36 = vpop.f32.mrb[46].mxu1 }
 0x232   :  { %v2142_v38 = vpop.f32.mrb[47].mxu1 }
 0x233   :  { %v3818_v8 = vadd.f32 %v3754_v50, %v865_v35  ;;  %v2143_v39 = vadd.f32 %v2142_v38, %v2141_v36 }
 0x235   :  { %v870_v41 = vadd.f32 %v2143_v39, %v3665_v22  ;;  %v2144_v42 = vpop.f32.mrb[48].mxu1 }
 0x236   :  { %v2145_v43 = vpop.f32.mrb[49].mxu1 }
 0x237   :  { %v3822_v14 = vadd.f32 %v3756_v55, %v870_v41  ;;  %v2146_v47 = vadd.f32 %v2145_v43, %v2144_v42 }
 0x239   :  { %v875_v44 = vadd.f32 %v2146_v47, %v3667_v25  ;;  %v2259_v46 = vpop.f32.mrb[50].mxu1 }
 0x23a   :  { %v2260_v49 = vpop.f32.mrb[51].mxu1 }
 0x23b   :  { %v3826_v17 = vadd.f32 %v3758_v58, %v875_v44  ;;  %v2261_v51 = vadd.f32 %v2260_v49, %v2259_v46 }
 0x23d   :  { %v2262_v54 = vpop.f32.mrb[52].mxu1  ;;  %v3829_v50 = vadd.f32 %v2261_v51, %v3766_v12 }
 0x23e   :  { %v2263_v52 = vpop.f32.mrb[53].mxu1 }
 0x23f   :  { %v2264_v22 = vadd.f32 %v2263_v52, %v2262_v54  ;;  %v1168_v26 = vsel %vm317_vm2, %v3829_v50, 0.0 }
 0x240   :  { %1169 = vadd.xlane.f32.xlu0 %v1168_v26 }
 0x241   :  { %v2265_v55 = vpop.f32.mrb[54].mxu1  ;;  %v3834_v57 = vadd.f32 %v2264_v22, %v3770_v20 }
 0x242   :  { %v2266_v25 = vpop.f32.mrb[55].mxu1 }
 0x243   :  { %v2267_v62 = vadd.f32 %v2266_v25, %v2265_v55  ;;  %v1171_v58 = vsel %vm317_vm2, %v3834_v57, 0.0 }
 0x244   :  { %1172 = vadd.xlane.f32.xlu1 %v1171_v58 }
 0x245   :  { %v2268_v59 = vpop.f32.mrb[56].mxu1  ;;  %v3839_v12 = vadd.f32 %v2267_v62, %v3774_v29 }
 0x246   :  { %v2269_v63 = vpop.f32.mrb[57].mxu1 }
 0x247   :  { %v2270_v1 = vadd.f32 %v2269_v63, %v2268_v59  ;;  %v1174_v3 = vsel %vm317_vm2, %v3839_v12, 0.0 }
 0x248   :  { %1175 = vadd.xlane.f32.xlu1 %v1174_v3 }
 0x249   :  { %v2271_v2 = vpop.f32.mrb[58].mxu1  ;;  %v3844_v20 = vadd.f32 %v2270_v1, %v3778_v32 }
 0x24a   :  { %v2272_v4 = vpop.f32.mrb[59].mxu1 }
 0x24b   :  { %v2273_v6 = vadd.f32 %v2272_v4, %v2271_v2  ;;  %v1177_v7 = vsel %vm317_vm2, %v3844_v20, 0.0 }
 0x24c   :  { %1178 = vadd.xlane.f32.xlu0 %v1177_v7 }
 0x24d   :  { %v2274_v10 = vpop.f32.mrb[60].mxu1  ;;  %v3849_v29 = vadd.f32 %v2273_v6, %v3782_v37 }
 0x24e   :  { %v2275_v11 = vpop.f32.mrb[61].mxu1 }
 0x24f   :  { %v2276_v13 = vadd.f32 %v2275_v11, %v2274_v10  ;;  %v1180_v15 = vsel %vm317_vm2, %v3849_v29, 0.0 }
 0x250   :  { %1181 = vadd.xlane.f32.xlu1 %v1180_v15 }
 0x251   :  { %v2277_v16 = vpop.f32.mrb[62].mxu1  ;;  %v3854_v32 = vadd.f32 %v2276_v13, %v3786_v40 }
 0x252   :  { %v2278_v18 = vpop.f32.mrb[63].mxu1 }
 0x253   :  { %v2279_v19 = vadd.f32 %v2278_v18, %v2277_v16  ;;  %v1183_v21 = vsel %vm317_vm2, %v3854_v32, 0.0  ;;  %v1377_v18 = vld [vmem:[%s4212_s5 + $0x8] sm:$0xff] }
 0x254   :  { %1184 = vadd.xlane.f32.xlu0 %v1183_v21  ;;  %v1379_v21 = vld [vmem:[%s4212_s5 + $0x18] sm:$0xff] }
 0x255   :  { %v2280_v23 = vpop.f32.mrb[64].mxu1  ;;  %v3859_v37 = vadd.f32 %v2279_v19, %v3790_v45 }
 0x256   :  { %v2281_v24 = vpop.f32.mrb[65].mxu1 }
 0x257   :  { %v2282_v27 = vadd.f32 %v2281_v24, %v2280_v23  ;;  %v1186_v28 = vsel %vm317_vm2, %v3859_v37, 0.0 }
 0x258   :  { %1187 = vadd.xlane.f32.xlu1 %v1186_v28 }
 0x259   :  { %v2283_v30 = vpop.f32.mrb[66].mxu1  ;;  %v3864_v40 = vadd.f32 %v2282_v27, %v3794_v48 }
 0x25a   :  { %v2284_v31 = vpop.f32.mrb[67].mxu1 }
 0x25b   :  { %v2285_v33 = vadd.f32 %v2284_v31, %v2283_v30  ;;  %v1189_v34 = vsel %vm317_vm2, %v3864_v40, 0.0 }
 0x25c   :  { %1190 = vadd.xlane.f32.xlu0 %v1189_v34 }
 0x25d   :  { %v2286_v35 = vpop.f32.mrb[68].mxu1  ;;  %v3869_v45 = vadd.f32 %v2285_v33, %v3798_v53 }
 0x25e   :  { %v2287_v36 = vpop.f32.mrb[69].mxu1 }
 0x25f   :  { %v2288_v38 = vadd.f32 %v2287_v36, %v2286_v35  ;;  %v1192_v39 = vsel %vm317_vm2, %v3869_v45, 0.0 }
 0x260   :  { %1193 = vadd.xlane.f32.xlu1 %v1192_v39 }
 0x261   :  { %v2289_v41 = vpop.f32.mrb[70].mxu1  ;;  %v3874_v48 = vadd.f32 %v2288_v38, %v3802_v56 }
 0x262   :  { %v2290_v42 = vpop.f32.mrb[71].mxu1 }
 0x263   :  { %v2291_v43 = vadd.f32 %v2290_v42, %v2289_v41  ;;  %v1195_v47 = vsel %vm317_vm2, %v3874_v48, 0.0 }
 0x264   :  { %1196 = vadd.xlane.f32.xlu0 %v1195_v47 }
 0x265   :  { %v2292_v44 = vpop.f32.mrb[72].mxu1  ;;  %v3879_v53 = vadd.f32 %v2291_v43, %v3806_v61 }
 0x266   :  { %v2293_v46 = vpop.f32.mrb[73].mxu1 }
 0x267   :  { %v2294_v49 = vadd.f32 %v2293_v46, %v2292_v44  ;;  %v1198_v51 = vsel %vm317_vm2, %v3879_v53, 0.0 }
 0x268   :  { %1199 = vadd.xlane.f32.xlu1 %v1198_v51  ;;  %v320_v55 = vpop.xlane.xlu0 %319 }
 0x269   :  { %v2295_v54 = vpop.f32.mrb[74].mxu1  ;;  %v3884_v56 = vadd.f32 %v2294_v49, %v3810_v0  ;;  %v322_v58 = vmul.f32 0.03125, %v320_v55 }
 0x26a   :  { %v2296_v52 = vpop.f32.mrb[75].mxu1 }
 0x26b   :  { %v2297_v22 = vadd.f32 %v2296_v52, %v2295_v54  ;;  %v1201_v26 = vsel %vm317_vm2, %v3884_v56, 0.0  ;;  %v3897_v2 = vsub.f32 %v3760_v60, %v322_v58 }
 0x26c   :  { %1202 = vadd.xlane.f32.xlu0 %v1201_v26 }
 0x26d   :  { %v2298_v25 = vpop.f32.mrb[76].mxu1  ;;  %v3889_v61 = vadd.f32 %v2297_v22, %v3814_v5 }
 0x26e   :  { %v2299_v62 = vpop.f32.mrb[77].mxu1 }
 0x26f   :  { %v2300_v59 = vadd.f32 %v2299_v62, %v2298_v25  ;;  %v1204_v63 = vsel %vm317_vm2, %v3889_v61, 0.0 }
 0x270   :  { %1205 = vadd.xlane.f32.xlu1 %v1204_v63 }
 0x271   :  { %v2301_v0 = vpop.f32.mrb[78].mxu1  ;;  %v3894_v1 = vadd.f32 %v2300_v59, %v3818_v8  ;;  %v324_v8 = vmul.f32 %v3897_v2, %v3897_v2 }
 0x272   :  { %v2302_v3 = vpop.f32.mrb[79].mxu1 }
 0x273   :  { %v2303_v4 = vadd.f32 %v2302_v3, %v2301_v0  ;;  %v1207_v5 = vsel %vm317_vm2, %v3894_v1, 0.0  ;;  %v325_v15 = vsel %vm317_vm2, %v324_v8, 0.0 }
 0x274   :  { %1208 = vadd.xlane.f32.xlu0 %v1207_v5 }
 0x275   :  { %v2304_v6 = vpop.f32.mrb[80].mxu1  ;;  %v3902_v7 = vadd.f32 %v2303_v4, %v3822_v14  ;;  %v1376_v14 = vld [vmem:[%s4212_s5] sm:$0xff] }
 0x276   :  { %v2305_v10 = vpop.f32.mrb[81].mxu1  ;;  %v2663_v19 = vpack.c.bf16 %v1377_v18, %v1376_v14 }
 0x277   :  { %v2306_v11 = vadd.f32 %v2305_v10, %v2304_v6  ;;  %v1210_v13 = vsel %vm317_vm2, %v3902_v7, 0.0  ;;  %v1454_v6 = vld [vmem:[%s4213_s6 + $0x8] sm:$0xff] }
 0x278   :  { %1211 = vadd.xlane.f32.xlu1 %v1210_v13  ;;  %2664 = vmatpush3.bf16.msra.mxu0 %v2663_v19 }
 0x279   :  { %v3909_v60 = vadd.f32 %v2306_v11, %v3826_v17  ;;  %2665 = vmatprep.subr.bf16.mxu0 %v2779_v9  ;;  %v1378_v17 = vld [vmem:[%s4212_s5 + $0x10] sm:$0xff] }
 0x27a   :  { %v2666_v23 = vpack.c.bf16 %v1379_v21, %v1378_v17 }
 0x27b   :  { %v1213_v16 = vsel %vm317_vm2, %v3909_v60, 0.0 }
 0x27c   :  { %326 = vadd.xlane.f32.xlu1 %v325_v15  ;;  %1214 = vadd.xlane.f32.xlu0 %v1213_v16 }
 0x27d   :  { %2667 = vmatpush3.bf16.msra.mxu0 %v2666_v23 }
 0x2cd   :  { %v1170_v24 = vpop.xlane.xlu0 %1169 }
 0x2ce   :  { %v1216_v27 = vmul.f32 0.03125, %v1170_v24 }
 0x2d0   :  { %v3928_v28 = vsub.f32 %v3829_v50, %v1216_v27 }
 0x2d1   :  { %v1173_v30 = vpop.xlane.xlu1 %1172 }
 0x2d2   :  { %v1217_v31 = vmul.f32 0.03125, %v1173_v30  ;;  %v1248_v33 = vmul.f32 %v3928_v28, %v3928_v28 }
 0x2d4   :  { %v3933_v34 = vsub.f32 %v3834_v57, %v1217_v31  ;;  %v1264_v35 = vsel %vm317_vm2, %v1248_v33, 0.0 }
 0x2d5   :  { %v1176_v36 = vpop.xlane.xlu1 %1175  ;;  %1265 = vadd.xlane.f32.xlu0 %v1264_v35 }
 0x2d6   :  { %v1218_v38 = vmul.f32 0.03125, %v1176_v36  ;;  %v1249_v39 = vmul.f32 %v3933_v34, %v3933_v34 }
 0x2d8   :  { %v3939_v41 = vsub.f32 %v3839_v12, %v1218_v38  ;;  %v1267_v50 = vsel %vm317_vm2, %v1249_v39, 0.0 }
 0x2d9   :  { %1268 = vadd.xlane.f32.xlu1 %v1267_v50  ;;  %v1179_v42 = vpop.xlane.xlu0 %1178 }
 0x2da   :  { %v1219_v43 = vmul.f32 0.03125, %v1179_v42  ;;  %v1250_v57 = vmul.f32 %v3939_v41, %v3939_v41 }
 0x2dc   :  { %v3945_v47 = vsub.f32 %v3844_v20, %v1219_v43  ;;  %v1270_v44 = vsel %vm317_vm2, %v1250_v57, 0.0 }
 0x2dd   :  { %v1182_v46 = vpop.xlane.xlu1 %1181  ;;  %1271 = vadd.xlane.f32.xlu0 %v1270_v44 }
 0x2de   :  { %v1220_v49 = vmul.f32 0.03125, %v1182_v46  ;;  %v1251_v12 = vmul.f32 %v3945_v47, %v3945_v47 }
 0x2e0   :  { %v3951_v51 = vsub.f32 %v3849_v29, %v1220_v49  ;;  %v1273_v54 = vsel %vm317_vm2, %v1251_v12, 0.0 }
 0x2e1   :  { %1274 = vadd.xlane.f32.xlu1 %v1273_v54  ;;  %v1185_v52 = vpop.xlane.xlu0 %1184 }
 0x2e2   :  { %v1221_v22 = vmul.f32 0.03125, %v1185_v52  ;;  %v1252_v20 = vmul.f32 %v3951_v51, %v3951_v51 }
 0x2e4   :  { %v3957_v26 = vsub.f32 %v3854_v32, %v1221_v22  ;;  %v1276_v55 = vsel %vm317_vm2, %v1252_v20, 0.0 }
 0x2e5   :  { %v1188_v25 = vpop.xlane.xlu1 %1187  ;;  %1277 = vadd.xlane.f32.xlu0 %v1276_v55 }
 0x2e6   :  { %v1222_v62 = vmul.f32 0.03125, %v1188_v25  ;;  %v1253_v29 = vmul.f32 %v3957_v26, %v3957_v26 }
 0x2e8   :  { %v3963_v58 = vsub.f32 %v3859_v37, %v1222_v62  ;;  %v1279_v59 = vsel %vm317_vm2, %v1253_v29, 0.0  ;;  %v1453_v37 = vld [vmem:[%s4213_s6] sm:$0xff] }
 0x2e9   :  { %1280 = vadd.xlane.f32.xlu1 %v1279_v59  ;;  %v1191_v63 = vpop.xlane.xlu0 %1190  ;;  %v2668_v13 = vpack.c.bf16 %v1454_v6, %v1453_v37  ;;  %v1455_v59 = vld [vmem:[%s4213_s6 + $0x10] sm:$0xff] }
 0x2ea   :  { %v1223_v0 = vmul.f32 0.03125, %v1191_v63  ;;  %v1254_v32 = vmul.f32 %v3963_v58, %v3963_v58  ;;  %v1456_v63 = vld [vmem:[%s4213_s6 + $0x18] sm:$0xff] }
 0x2eb   :  { %2669 = vmatprep.subr.bf16.mxu0 %v2668_v13 }
 0x2ec   :  { %v3969_v3 = vsub.f32 %v3864_v40, %v1223_v0  ;;  %v1282_v4 = vsel %vm317_vm2, %v1254_v32, 0.0  ;;  %v2672_v32 = vpack.c.bf16 %v1456_v63, %v1455_v59 }
 0x2ed   :  { %v1194_v5 = vpop.xlane.xlu1 %1193  ;;  %1283 = vadd.xlane.f32.xlu0 %v1282_v4 }
 0x2ee   :  { %v1224_v10 = vmul.f32 0.03125, %v1194_v5  ;;  %v1255_v11 = vmul.f32 %v3969_v3, %v3969_v3 }
 0x2f0   :  { %v3981_v40 = vsub.f32 %v3869_v45, %v1224_v10  ;;  %v1285_v8 = vsel %vm317_vm2, %v1255_v11, 0.0 }
 0x2f1   :  { %1286 = vadd.xlane.f32.xlu1 %v1285_v8  ;;  %v1197_v15 = vpop.xlane.xlu0 %1196 }
 0x2f2   :  { %v1225_v16 = vmul.f32 0.03125, %v1197_v15  ;;  %v1256_v14 = vmul.f32 %v3981_v40, %v3981_v40 }
 0x2f4   :  { %v3987_v18 = vsub.f32 %v3874_v48, %v1225_v16  ;;  %v1288_v19 = vsel %vm317_vm2, %v1256_v14, 0.0 }
 0x2f5   :  { %v1200_v17 = vpop.xlane.xlu1 %1199  ;;  %1289 = vadd.xlane.f32.xlu0 %v1288_v19 }
 0x2f6   :  { %v1226_v21 = vmul.f32 0.03125, %v1200_v17  ;;  %v1257_v45 = vmul.f32 %v3987_v18, %v3987_v18 }
 0x2f8   :  { %v3993_v23 = vsub.f32 %v3879_v53, %v1226_v21  ;;  %v1291_v24 = vsel %vm317_vm2, %v1257_v45, 0.0 }
 0x2f9   :  { %1292 = vadd.xlane.f32.xlu1 %v1291_v24  ;;  %v1203_v27 = vpop.xlane.xlu0 %1202 }
 0x2fa   :  { %v1227_v30 = vmul.f32 0.03125, %v1203_v27  ;;  %v1258_v48 = vmul.f32 %v3993_v23, %v3993_v23 }
 0x2fc   :  { %v3999_v31 = vsub.f32 %v3884_v56, %v1227_v30  ;;  %v1294_v33 = vsel %vm317_vm2, %v1258_v48, 0.0 }
 0x2fd   :  { %v1206_v35 = vpop.xlane.xlu1 %1205  ;;  %1295 = vadd.xlane.f32.xlu0 %v1294_v33 }
 0x2fe   :  { %v1228_v36 = vmul.f32 0.03125, %v1206_v35  ;;  %v1259_v53 = vmul.f32 %v3999_v31, %v3999_v31 }
 0x300   :  { %v4005_v38 = vsub.f32 %v3889_v61, %v1228_v36  ;;  %v1297_v39 = vsel %vm317_vm2, %v1259_v53, 0.0 }
 0x301   :  { %1298 = vadd.xlane.f32.xlu1 %v1297_v39  ;;  %v1209_v50 = vpop.xlane.xlu0 %1208 }
 0x302   :  { %v1229_v42 = vmul.f32 0.03125, %v1209_v50  ;;  %v1260_v56 = vmul.f32 %v4005_v38, %v4005_v38 }
 0x304   :  { %v4011_v43 = vsub.f32 %v3894_v1, %v1229_v42  ;;  %v1300_v57 = vsel %vm317_vm2, %v1260_v56, 0.0 }
 0x305   :  { %v1212_v44 = vpop.xlane.xlu1 %1211  ;;  %1301 = vadd.xlane.f32.xlu0 %v1300_v57 }
 0x306   :  { %v1230_v46 = vmul.f32 0.03125, %v1212_v44  ;;  %v1261_v61 = vmul.f32 %v4011_v43, %v4011_v43 }
 0x308   :  { %v4017_v49 = vsub.f32 %v3902_v7, %v1230_v46  ;;  %v1303_v12 = vsel %vm317_vm2, %v1261_v61, 0.0 }
 0x309   :  { %v327_v54 = vpop.xlane.xlu1 %326  ;;  %1304 = vadd.xlane.f32.xlu1 %v1303_v12  ;;  %v1215_v52 = vpop.xlane.xlu0 %1214 }
 0x30a   :  { %v328_v22 = vmul.f32 0.03125, %v327_v54  ;;  %v1231_v20 = vmul.f32 0.03125, %v1215_v52  ;;  %v1262_v1 = vmul.f32 %v4017_v49, %v4017_v49 }
 0x30c   :  { %v329_v55 = vadd.f32 1e-05, %v328_v22  ;;  %v4023_v25 = vsub.f32 %v3909_v60, %v1231_v20  ;;  %v1306_v62 = vsel %vm317_vm2, %v1262_v1, 0.0 }
 0x30d   :  { %1307 = vadd.xlane.f32.xlu0 %v1306_v62 }
 0x30e   :  { %2711 = vrsqrt.f32 %v329_v55  ;;  %v1263_v7 = vmul.f32 %v4023_v25, %v4023_v25 }
 0x310   :  { %v1309_v29 = vsel %vm317_vm2, %v1263_v7, 0.0 }
 0x311   :  { %1310 = vadd.xlane.f32.xlu1 %v1309_v29 }
 0x318   :  { %v2712_v60 = vpop.eup %2711 }
 0x319   :  { %v331_v0 = vmul.f32 %v2712_v60, %v3897_v2 }
 0x31b   :  { %2429 = vmatmul.mubr.msk.f32.vlgmr.msra.gmra.mrb[64].mxu0 %vm317_vm2, %v331_v0 }
 0x31c   :  { %2671 = vmatpush3.bf16.msra.mxu0 %v2668_v13 }
 0x31d   :  { %2673 = vmatprep.subr.bf16.mxu0 %v2672_v32 }
 0x320   :  { %2675 = vmatpush3.bf16.msra.mxu0 %v2672_v32 }
 0x362   :  { %v1266_v4 = vpop.xlane.xlu0 %1265 }
 0x363   :  { %v1312_v5 = vmul.f32 0.03125, %v1266_v4 }
 0x365   :  { %v1328_v37 = vadd.f32 1e-05, %v1312_v5 }
 0x366   :  { %v1269_v6 = vpop.xlane.xlu1 %1268 }
 0x367   :  { %2713 = vrsqrt.f32 %v1328_v37  ;;  %v1313_v10 = vmul.f32 0.03125, %v1269_v6 }
 0x369   :  { %v1329_v11 = vadd.f32 1e-05, %v1313_v10 }
 0x36a   :  { %v1272_v8 = vpop.xlane.xlu0 %1271 }
 0x36b   :  { %2715 = vrsqrt.f32 %v1329_v11  ;;  %v1314_v15 = vmul.f32 0.03125, %v1272_v8 }
 0x36d   :  { %v1330_v16 = vadd.f32 1e-05, %v1314_v15 }
 0x36e   :  { %v1275_v14 = vpop.xlane.xlu1 %1274 }
 0x36f   :  { %2717 = vrsqrt.f32 %v1330_v16  ;;  %v1315_v2 = vmul.f32 0.03125, %v1275_v14 }
 0x371   :  { %v2714_v19 = vpop.eup %2713  ;;  %v1331_v17 = vadd.f32 1e-05, %v1315_v2 }
 0x372   :  { %v1278_v21 = vpop.xlane.xlu0 %1277  ;;  %v1360_v13 = vmul.f32 %v2714_v19, %v3928_v28 }
 0x373   :  { %2719 = vrsqrt.f32 %v1331_v17  ;;  %v1316_v45 = vmul.f32 0.03125, %v1278_v21 }
 0x374   :  { %2439 = vmatprep.mubr.msk.f32.mxu0 %vm317_vm2, %v1360_v13 }
 0x375   :  { %v2716_v24 = vpop.eup %2715  ;;  %v1332_v27 = vadd.f32 1e-05, %v1316_v45 }
 0x376   :  { %v1281_v30 = vpop.xlane.xlu1 %1280  ;;  %v1361_v48 = vmul.f32 %v2716_v24, %v3933_v34 }
 0x377   :  { %2721 = vrsqrt.f32 %v1332_v27  ;;  %v1317_v33 = vmul.f32 0.03125, %v1281_v30 }
 0x378   :  { %2440 = vmatmul.mubr.msk.f32.vlgmr.msra.gmra.mrb[66].mxu0 %vm317_vm2, %v1361_v48 }
 0x379   :  { %v2718_v35 = vpop.eup %2717  ;;  %v1333_v36 = vadd.f32 1e-05, %v1317_v33 }
 0x37a   :  { %v1284_v53 = vpop.xlane.xlu0 %1283  ;;  %v1362_v39 = vmul.f32 %v2718_v35, %v3939_v41 }
 0x37b   :  { %2723 = vrsqrt.f32 %v1333_v36  ;;  %v1318_v28 = vmul.f32 0.03125, %v1284_v53 }
 0x37c   :  { %2442 = vmatprep.mubr.msk.f32.mxu0 %vm317_vm2, %v1362_v39 }
 0x37d   :  { %v2720_v50 = vpop.eup %2719  ;;  %v1334_v42 = vadd.f32 1e-05, %v1318_v28 }
 0x37e   :  { %v1287_v56 = vpop.xlane.xlu1 %1286  ;;  %v1363_v57 = vmul.f32 %v2720_v50, %v3945_v47 }
 0x37f   :  { %2725 = vrsqrt.f32 %v1334_v42  ;;  %v1319_v34 = vmul.f32 0.03125, %v1287_v56 }
 0x380   :  { %2443 = vmatmul.mubr.msk.f32.gmra.mrb[68].mxu0 %vm317_vm2, %v1363_v57 }
 0x381   :  { %v2722_v44 = vpop.eup %2721  ;;  %v1335_v46 = vadd.f32 1e-05, %v1319_v34 }
 0x382   :  { %v1290_v61 = vpop.xlane.xlu0 %1289  ;;  %v1364_v12 = vmul.f32 %v2722_v44, %v3951_v51 }
 0x383   :  { %2727 = vrsqrt.f32 %v1335_v46  ;;  %v1320_v41 = vmul.f32 0.03125, %v1290_v61 }
 0x384   :  { %2445 = vmatprep.mubr.msk.f32.mxu0 %vm317_vm2, %v1364_v12 }
 0x385   :  { %v2724_v54 = vpop.eup %2723  ;;  %v1336_v52 = vadd.f32 1e-05, %v1320_v41 }
 0x386   :  { %v1293_v22 = vpop.xlane.xlu1 %1292  ;;  %v1365_v20 = vmul.f32 %v2724_v54, %v3957_v26 }
 0x387   :  { %2729 = vrsqrt.f32 %v1336_v52  ;;  %v1321_v47 = vmul.f32 0.03125, %v1293_v22 }
 0x388   :  { %2446 = vmatmul.mubr.msk.f32.gmra.mrb[70].mxu0 %vm317_vm2, %v1365_v20 }
 0x389   :  { %v2726_v1 = vpop.eup %2725  ;;  %v1337_v55 = vadd.f32 1e-05, %v1321_v47 }
 0x38a   :  { %v1296_v62 = vpop.xlane.xlu0 %1295  ;;  %v1366_v7 = vmul.f32 %v2726_v1, %v3963_v58 }
 0x38b   :  { %2731 = vrsqrt.f32 %v1337_v55  ;;  %v1322_v51 = vmul.f32 0.03125, %v1296_v62 }
 0x38c   :  { %2448 = vmatprep.mubr.msk.f32.mxu0 %vm317_vm2, %v1366_v7 }
 0x38d   :  { %v2728_v29 = vpop.eup %2727  ;;  %v1338_v59 = vadd.f32 1e-05, %v1322_v51 }
 0x38e   :  { %v1299_v63 = vpop.xlane.xlu1 %1298  ;;  %v1367_v60 = vmul.f32 %v2728_v29, %v3969_v3 }
 0x38f   :  { %2733 = vrsqrt.f32 %v1338_v59  ;;  %v1323_v26 = vmul.f32 0.03125, %v1299_v63 }
 0x390   :  { %2449 = vmatmul.mubr.msk.f32.gmra.mrb[72].mxu0 %vm317_vm2, %v1367_v60 }
 0x391   :  { %v2730_v0 = vpop.eup %2729  ;;  %v1339_v32 = vadd.f32 1e-05, %v1323_v26 }
 0x392   :  { %v1302_v4 = vpop.xlane.xlu0 %1301  ;;  %v1368_v5 = vmul.f32 %v2730_v0, %v3981_v40 }
 0x393   :  { %2735 = vrsqrt.f32 %v1339_v32  ;;  %v1324_v58 = vmul.f32 0.03125, %v1302_v4 }
 0x394   :  { %2451 = vmatprep.mubr.msk.f32.mxu0 %vm317_vm2, %v1368_v5 }
 0x395   :  { %v2732_v37 = vpop.eup %2731  ;;  %v1340_v6 = vadd.f32 1e-05, %v1324_v58 }
 0x396   :  { %v1305_v10 = vpop.xlane.xlu1 %1304  ;;  %v1369_v11 = vmul.f32 %v2732_v37, %v3987_v18 }
 0x397   :  { %2737 = vrsqrt.f32 %v1340_v6  ;;  %v1325_v3 = vmul.f32 0.03125, %v1305_v10 }
 0x398   :  { %2452 = vmatmul.mubr.msk.f32.gmra.mrb[74].mxu0 %vm317_vm2, %v1369_v11 }
 0x399   :  { %v2734_v8 = vpop.eup %2733  ;;  %v1341_v15 = vadd.f32 1e-05, %v1325_v3 }
 0x39a   :  { %v1308_v16 = vpop.xlane.xlu0 %1307  ;;  %v1370_v14 = vmul.f32 %v2734_v8, %v3993_v23 }
 0x39b   :  { %2739 = vrsqrt.f32 %v1341_v15  ;;  %v1326_v40 = vmul.f32 0.03125, %v1308_v16 }
 0x39c   :  { %2454 = vmatprep.mubr.msk.f32.mxu0 %vm317_vm2, %v1370_v14 }
 0x39d   :  { %v2736_v2 = vpop.eup %2735  ;;  %v1342_v19 = vadd.f32 1e-05, %v1326_v40 }
 0x39e   :  { %v1311_v17 = vpop.xlane.xlu1 %1310  ;;  %v1371_v21 = vmul.f32 %v2736_v2, %v3999_v31 }
 0x39f   :  { %2741 = vrsqrt.f32 %v1342_v19  ;;  %v1327_v18 = vmul.f32 0.03125, %v1311_v17 }
 0x3a0   :  { %2455 = vmatmul.mubr.msk.f32.gmra.mrb[76].mxu0 %vm317_vm2, %v1371_v21 }
 0x3a1   :  { %v2738_v13 = vpop.eup %2737  ;;  %v1343_v45 = vadd.f32 1e-05, %v1327_v18 }
 0x3a2   :  { %v1372_v24 = vmul.f32 %v2738_v13, %v4005_v38 }
 0x3a3   :  { %2743 = vrsqrt.f32 %v1343_v45 }
 0x3a4   :  { %2457 = vmatprep.mubr.msk.f32.mxu0 %vm317_vm2, %v1372_v24 }
 0x3a5   :  { %v2740_v23 = vpop.eup %2739 }
 0x3a6   :  { %v1373_v27 = vmul.f32 %v2740_v23, %v4011_v43 }
 0x3a8   :  { %2458 = vmatmul.mubr.msk.f32.gmra.mrb[78].mxu0 %vm317_vm2, %v1373_v27 }
 0x3a9   :  { %v2742_v30 = vpop.eup %2741 }
 0x3aa   :  { %v1374_v48 = vmul.f32 %v2742_v30, %v4017_v49 }
 0x3ac   :  { %2460 = vmatprep.mubr.msk.f32.mxu0 %vm317_vm2, %v1374_v48 }
 0x3ad   :  { %v2744_v31 = vpop.eup %2743 }
 0x3ae   :  { %v1375_v33 = vmul.f32 %v2744_v31, %v4023_v25 }
 0x3b0   :  { %2461 = vmatmul.mubr.msk.f32.gmra.mrb[80].mxu0 %vm317_vm2, %v1375_v33 }
 0x3ee   :  { %v4069_v35 = vpop.f32.mrb[64].mxu0 }
 0x3ef   :  { %v2430_v38 = vpop.f32.mrb[65].mxu0  ;;  %v1650_v2 = vmul.f32 %v4069_v35, %v4069_v35 }
 0x3f1   :  { %v1651_v17 = vsel %vm317_vm2, %v1650_v2, 0.0 }
 0x44b   :  { %v4071_v36 = vpop.f32.mrb[66].mxu0 }
 0x44c   :  { %v1658_v43 = vmul.f32 %v4071_v36, %v4071_v36  ;;  %v4075_v53 = vpop.f32.mrb[67].mxu0 }
 0x44d   :  { %v1657_v49 = vmul.f32 %v4075_v53, %v4075_v53 }
 0x44e   :  { %v1676_v39 = vsel %vm317_vm2, %v1658_v43, 0.0 }
 0x44f   :  { %1677 = vadd.xlane.f32.xlu1 %v1676_v39  ;;  %v1673_v25 = vsel %vm317_vm2, %v1657_v49, 0.0 }
 0x450   :  { %1674 = vadd.xlane.f32.xlu0 %v1673_v25 }
 0x453   :  { %v4081_v28 = vpop.f32.mrb[68].mxu0 }
 0x454   :  { %v1660_v50 = vmul.f32 %v4081_v28, %v4081_v28  ;;  %v4085_v42 = vpop.f32.mrb[69].mxu0 }
 0x455   :  { %v1659_v56 = vmul.f32 %v4085_v42, %v4085_v42 }
 0x456   :  { %v1682_v57 = vsel %vm317_vm2, %v1660_v50, 0.0 }
 0x457   :  { %1683 = vadd.xlane.f32.xlu1 %v1682_v57  ;;  %v1679_v34 = vsel %vm317_vm2, %v1659_v56, 0.0 }
 0x458   :  { %1680 = vadd.xlane.f32.xlu0 %v1679_v34 }
 0x45b   :  { %v4091_v44 = vpop.f32.mrb[70].mxu0 }
 0x45c   :  { %v1662_v46 = vmul.f32 %v4091_v44, %v4091_v44  ;;  %v4095_v61 = vpop.f32.mrb[71].mxu0 }
 0x45d   :  { %v1661_v12 = vmul.f32 %v4095_v61, %v4095_v61 }
 0x45e   :  { %v1688_v41 = vsel %vm317_vm2, %v1662_v46, 0.0 }
 0x45f   :  { %1689 = vadd.xlane.f32.xlu1 %v1688_v41  ;;  %v1685_v54 = vsel %vm317_vm2, %v1661_v12, 0.0 }
 0x460   :  { %1686 = vadd.xlane.f32.xlu0 %v1685_v54 }
 0x463   :  { %v4101_v52 = vpop.f32.mrb[72].mxu0 }
 0x464   :  { %v1664_v22 = vmul.f32 %v4101_v52, %v4101_v52  ;;  %v4105_v20 = vpop.f32.mrb[73].mxu0 }
 0x465   :  { %v1663_v47 = vmul.f32 %v4105_v20, %v4105_v20 }
 0x466   :  { %v1694_v1 = vsel %vm317_vm2, %v1664_v22, 0.0 }
 0x467   :  { %1695 = vadd.xlane.f32.xlu1 %v1694_v1  ;;  %v1691_v55 = vsel %vm317_vm2, %v1663_v47, 0.0 }
 0x468   :  { %1692 = vadd.xlane.f32.xlu0 %v1691_v55 }
 0x46b   :  { %v4111_v62 = vpop.f32.mrb[74].mxu0 }
 0x46c   :  { %v1666_v7 = vmul.f32 %v4111_v62, %v4111_v62  ;;  %v4115_v51 = vpop.f32.mrb[75].mxu0 }
 0x46d   :  { %v1665_v29 = vmul.f32 %v4115_v51, %v4115_v51 }
 0x46e   :  { %v1700_v59 = vsel %vm317_vm2, %v1666_v7, 0.0 }
 0x46f   :  { %1701 = vadd.xlane.f32.xlu1 %v1700_v59  ;;  %v1697_v63 = vsel %vm317_vm2, %v1665_v29, 0.0 }
 0x470   :  { %1698 = vadd.xlane.f32.xlu0 %v1697_v63 }
 0x473   :  { %v4121_v60 = vpop.f32.mrb[76].mxu0 }
 0x474   :  { %v1668_v26 = vmul.f32 %v4121_v60, %v4121_v60  ;;  %v4125_v0 = vpop.f32.mrb[77].mxu0 }
 0x475   :  { %v1667_v32 = vmul.f32 %v4125_v0, %v4125_v0 }
 0x476   :  { %v1706_v4 = vsel %vm317_vm2, %v1668_v26, 0.0 }
 0x477   :  { %1707 = vadd.xlane.f32.xlu1 %v1706_v4  ;;  %v1703_v5 = vsel %vm317_vm2, %v1667_v32, 0.0 }
 0x478   :  { %1704 = vadd.xlane.f32.xlu0 %v1703_v5 }
 0x47b   :  { %v4131_v58 = vpop.f32.mrb[78].mxu0 }
 0x47c   :  { %v1670_v37 = vmul.f32 %v4131_v58, %v4131_v58  ;;  %v4135_v6 = vpop.f32.mrb[79].mxu0 }
 0x47d   :  { %v1669_v10 = vmul.f32 %v4135_v6, %v4135_v6 }
 0x47e   :  { %v1712_v11 = vsel %vm317_vm2, %v1670_v37, 0.0 }
 0x47f   :  { %1713 = vadd.xlane.f32.xlu1 %v1712_v11  ;;  %v1709_v3 = vsel %vm317_vm2, %v1669_v10, 0.0 }
 0x480   :  { %1710 = vadd.xlane.f32.xlu0 %v1709_v3 }
 0x483   :  { %v4141_v8 = vpop.f32.mrb[80].mxu0 }
 0x484   :  { %v1672_v15 = vmul.f32 %v4141_v8, %v4141_v8  ;;  %v4145_v16 = vpop.f32.mrb[81].mxu0 }
 0x485   :  { %v1671_v14 = vmul.f32 %v4145_v16, %v4145_v16 }
 0x486   :  { %v1718_v40 = vsel %vm317_vm2, %v1672_v15, 0.0 }
 0x487   :  { %1719 = vadd.xlane.f32.xlu1 %v1718_v40  ;;  %v1715_v19 = vsel %vm317_vm2, %v1671_v14, 0.0 }
 0x488   :  { %1716 = vadd.xlane.f32.xlu0 %v1715_v19 }
 0x48c   :  { %1652 = vadd.xlane.f32.xlu0 %v1651_v17 }
 0x4dc   :  { %v1678_v21 = vpop.xlane.xlu1 %1677 }
 0x4dd   :  { %v1722_v18 = vadd.f32 1e-12, %v1678_v21  ;;  %v1675_v13 = vpop.xlane.xlu0 %1674 }
 0x4de   :  { %v1721_v45 = vadd.f32 1e-12, %v1675_v13 }
 0x4df   :  { %2745 = vrsqrt.f32 %v1722_v18 }
 0x4e0   :  { %2747 = vrsqrt.f32 %v1721_v45 }
 0x4e4   :  { %v1684_v24 = vpop.xlane.xlu1 %1683 }
 0x4e5   :  { %v1724_v23 = vadd.f32 1e-12, %v1684_v24  ;;  %v1681_v27 = vpop.xlane.xlu0 %1680 }
 0x4e6   :  { %v1723_v30 = vadd.f32 1e-12, %v1681_v27 }
 0x4e7   :  { %2749 = vrsqrt.f32 %v1724_v23 }
 0x4e8   :  { %2751 = vrsqrt.f32 %v1723_v30 }
 0x4e9   :  { %v2746_v48 = vpop.eup %2745 }
 0x4ea   :  { %v2748_v31 = vpop.eup %2747  ;;  %v1754_v33 = vmul.f32 %v2746_v48, %v4071_v36 }
 0x4eb   :  { %v1753_v38 = vmul.f32 %v2748_v31, %v4075_v53 }
 0x4ec   :  { %v1690_v43 = vpop.xlane.xlu1 %1689 }
 0x4ed   :  { %v1726_v39 = vadd.f32 1e-12, %v1690_v43  ;;  %v1687_v25 = vpop.xlane.xlu0 %1686  ;;  %v2677_v50 = vpack.c.bf16 %v1754_v33, %v1753_v38 }
 0x4ee   :  { %v1725_v56 = vadd.f32 1e-12, %v1687_v25 }
 0x4ef   :  { %2753 = vrsqrt.f32 %v1726_v39  ;;  %2679 = vmatpush3.bf16.xpose.msk.msra.mxu1 %vm4158_vm3, %v2677_v50 }
 0x4f0   :  { %2755 = vrsqrt.f32 %v1725_v56  ;;  %2680 = vmatprep.subr.bf16.mxu1 %v2779_v9 }
 0x4f1   :  { %v2750_v36 = vpop.eup %2749 }
 0x4f2   :  { %v2752_v53 = vpop.eup %2751  ;;  %v1756_v57 = vmul.f32 %v2750_v36, %v4081_v28  ;;  %v1891_v36 = vstv %s4214_s7 }
 0x4f3   :  { %v1755_v34 = vmul.f32 %v2752_v53, %v4085_v42 }
 0x4f4   :  { %v1696_v46 = vpop.xlane.xlu1 %1695 }
 0x4f5   :  { %v1728_v12 = vadd.f32 1e-12, %v1696_v46  ;;  %v1693_v41 = vpop.xlane.xlu0 %1692  ;;  %v2681_v54 = vpack.c.bf16 %v1756_v57, %v1755_v34 }
 0x4f6   :  { %v1727_v22 = vadd.f32 1e-12, %v1693_v41 }
 0x4f7   :  { %2757 = vrsqrt.f32 %v1728_v12  ;;  %2683 = vmatpush3.bf16.xpose.msk.msra.mxu1 %vm4158_vm3, %v2681_v54 }
 0x4f8   :  { %2759 = vrsqrt.f32 %v1727_v22  ;;  %2684 = vmatprep.subr.bf16.mxu1 %v2779_v9 }
 0x4f9   :  { %v2754_v47 = vpop.eup %2753 }
 0x4fa   :  { %v2756_v1 = vpop.eup %2755  ;;  %v1758_v55 = vmul.f32 %v2754_v47, %v4091_v44 }
 0x4fb   :  { %v1757_v28 = vmul.f32 %v2756_v1, %v4095_v61 }
 0x4fc   :  { %v1702_v7 = vpop.xlane.xlu1 %1701 }
 0x4fd   :  { %v1730_v42 = vadd.f32 1e-12, %v1702_v7  ;;  %v1699_v29 = vpop.xlane.xlu0 %1698  ;;  %v2685_v59 = vpack.c.bf16 %v1758_v55, %v1757_v28 }
 0x4fe   :  { %v1729_v63 = vadd.f32 1e-12, %v1699_v29 }
 0x4ff   :  { %2761 = vrsqrt.f32 %v1730_v42  ;;  %2687 = vmatpush3.bf16.xpose.msk.msra.mxu1 %vm4158_vm3, %v2685_v59 }
 0x500   :  { %2763 = vrsqrt.f32 %v1729_v63  ;;  %2688 = vmatprep.subr.bf16.mxu1 %v2779_v9 }
 0x501   :  { %v2758_v26 = vpop.eup %2757 }
 0x502   :  { %v2760_v32 = vpop.eup %2759  ;;  %v1760_v4 = vmul.f32 %v2758_v26, %v4101_v52 }
 0x503   :  { %v1759_v44 = vmul.f32 %v2760_v32, %v4105_v20 }
 0x504   :  { %v1708_v5 = vpop.xlane.xlu1 %1707 }
 0x505   :  { %v1732_v61 = vadd.f32 1e-12, %v1708_v5  ;;  %v1705_v37 = vpop.xlane.xlu0 %1704  ;;  %v2689_v10 = vpack.c.bf16 %v1760_v4, %v1759_v44 }
 0x506   :  { %v1731_v11 = vadd.f32 1e-12, %v1705_v37 }
 0x507   :  { %2765 = vrsqrt.f32 %v1732_v61  ;;  %2691 = vmatpush3.bf16.xpose.msk.msra.mxu1 %vm4158_vm3, %v2689_v10 }
 0x508   :  { %2767 = vrsqrt.f32 %v1731_v11  ;;  %2692 = vmatprep.subr.bf16.mxu1 %v2779_v9 }
 0x509   :  { %v2762_v3 = vpop.eup %2761 }
 0x50a   :  { %v2764_v15 = vpop.eup %2763  ;;  %v1762_v14 = vmul.f32 %v2762_v3, %v4111_v62 }
 0x50b   :  { %v1761_v52 = vmul.f32 %v2764_v15, %v4115_v51 }
 0x50c   :  { %v1714_v40 = vpop.xlane.xlu1 %1713 }
 0x50d   :  { %v1734_v20 = vadd.f32 1e-12, %v1714_v40  ;;  %v1711_v2 = vpop.xlane.xlu0 %1710  ;;  %v2693_v19 = vpack.c.bf16 %v1762_v14, %v1761_v52 }
 0x50e   :  { %v1733_v17 = vadd.f32 1e-12, %v1711_v2 }
 0x50f   :  { %2769 = vrsqrt.f32 %v1734_v20  ;;  %2695 = vmatpush3.bf16.xpose.msk.msra.mxu1 %vm4158_vm3, %v2693_v19 }
 0x510   :  { %2771 = vrsqrt.f32 %v1733_v17  ;;  %2696 = vmatprep.subr.bf16.mxu1 %v2779_v9 }
 0x511   :  { %v2766_v21 = vpop.eup %2765 }
 0x512   :  { %v2768_v18 = vpop.eup %2767  ;;  %v1764_v13 = vmul.f32 %v2766_v21, %v4121_v60 }
 0x513   :  { %v1763_v62 = vmul.f32 %v2768_v18, %v4125_v0 }
 0x514   :  { %v1720_v45 = vpop.xlane.xlu1 %1719 }
 0x515   :  { %v1736_v51 = vadd.f32 1e-12, %v1720_v45  ;;  %v1717_v24 = vpop.xlane.xlu0 %1716  ;;  %v2697_v23 = vpack.c.bf16 %v1764_v13, %v1763_v62 }
 0x516   :  { %v1735_v27 = vadd.f32 1e-12, %v1717_v24 }
 0x517   :  { %2773 = vrsqrt.f32 %v1736_v51  ;;  %2699 = vmatpush3.bf16.xpose.msk.msra.mxu1 %vm4158_vm3, %v2697_v23 }
 0x518   :  { %2775 = vrsqrt.f32 %v1735_v27  ;;  %2700 = vmatprep.subr.bf16.mxu1 %v2779_v9 }
 0x519   :  { %v2770_v30 = vpop.eup %2769  ;;  %v1653_v48 = vpop.xlane.xlu0 %1652 }
 0x51a   :  { %v2772_v31 = vpop.eup %2771  ;;  %v1766_v33 = vmul.f32 %v2770_v30, %v4131_v58  ;;  %v1654_v0 = vadd.f32 1e-12, %v1653_v48 }
 0x51b   :  { %v1765_v60 = vmul.f32 %v2772_v31, %v4135_v6 }
 0x51c   :  { %2777 = vrsqrt.f32 %v1654_v0 }
 0x51d   :  { %v2701_v38 = vpack.c.bf16 %v1766_v33, %v1765_v60 }
 0x51f   :  { %2703 = vmatpush3.bf16.xpose.msk.msra.mxu1 %vm4158_vm3, %v2701_v38 }
 0x520   :  { %2704 = vmatprep.subr.bf16.mxu1 %v2779_v9 }
 0x521   :  { %v2774_v43 = vpop.eup %2773 }
 0x522   :  { %v2776_v39 = vpop.eup %2775  ;;  %v1768_v25 = vmul.f32 %v2774_v43, %v4141_v8 }
 0x523   :  { %v1767_v50 = vmul.f32 %v2776_v39, %v4145_v16 }
 0x525   :  { %v2705_v56 = vpack.c.bf16 %v1768_v25, %v1767_v50 }
 0x526   :  { %v2778_v58 = vpop.eup %2777 }
 0x527   :  { %2707 = vmatpush3.bf16.xpose.msk.msra.mxu1 %vm4158_vm3, %v2705_v56  ;;  %v1656_v6 = vmul.f32 %v2778_v58, %v4069_v35 }
 0x52e   :  { %2496 = vmatmul.mubr.msk.f32.vlgmr.msra.gmra.mrb[82].mxu1 %vm317_vm2, %v1656_v6 }
 0x601   :  { %v1887_v9 = vpop.f32.mrb[82].mxu1 }
 0x602   :  { %v1892_v53 = vmul.f32 %v1891_v36, %v1887_v9  ;;  %v2497_v57 = vpop.f32.mrb[83].mxu1 }
 0x604   :  { %1893 = vst [vmem:[%s4215_s8] sm:$0xff] %v1892_v53 }

</bundles_post_ra>
